<compile_context>
chip_gen: v7x
topology: tpu7x:2x2x1
jax: 0.10.0
libtpu: 0.0.40
codegen_flags: <defaults>
</compile_context>

<pallas_src>
import functools

import jax
import jax.numpy as jnp
from jax import lax
from jax.experimental import pallas as pl
from jax.experimental.pallas import tpu as pltpu

LRELU_SLOPE = 0.1


def _resblock_stage_kernel(prev_ref, cur_ref, next_ref, w1_ref, b1_ref,
                           w2_ref, b2_ref, o_ref, *,
                           T, TT, dil, K, halo, compute_dtype):
    """out = conv2(lrelu(conv1(lrelu(x), dil) ), 1) + x  for one time tile.

    prev/next are `halo`-row neighbour blocks supplying the convolution halo
    for BOTH convs; 'same' zero padding (and OOB garbage from clamped /
    partial blocks) is emulated by masking on the global row index.
    """
    C = o_ref.shape[-1]
    P1 = dil * (K - 1) // 2          # conv1 padding (dilation dil)
    P2 = (K - 1) // 2                # conv2 padding (dilation 1)
    t = pl.program_id(0)             # time-tile index (leading grid axis)

    # x rows [t*TT - halo, t*TT + TT + halo): aligned full-block concatenation.
    x_full = jnp.concatenate([prev_ref[0], cur_ref[0], next_ref[0]], axis=0)
    rows = TT + 2 * halo
    g = lax.broadcasted_iota(jnp.int32, (rows, 1), 0) + (t * TT - halo)
    valid = (g >= 0) & (g < T)       # False => conv zero padding / OOB garbage

    # leaky_relu + padding mask in compute_dtype (bf16 on v6e/v7x).
    xb = x_full.astype(compute_dtype)
    xb = jnp.where(valid, xb, jnp.zeros((), compute_dtype))
    xlr = jnp.where(xb >= 0, xb, LRELU_SLOPE * xb)

    fuse_lanes = (C % 128 == 0)      # fold K taps into one K*C contraction

    def conv(xin, w_ref, b_ref, nrows, shifts, extra=None):
        """sum_k xin[s_k : s_k+nrows] @ w[k]  + bias (+ extra), f32 accum."""
        if fuse_lanes:
            taps = jnp.concatenate([xin[s:s + nrows, :] for s in shifts],
                                   axis=-1)                      # (nrows, K*C)
            acc = jnp.dot(taps, w_ref[...],
                          preferred_element_type=jnp.float32)
            bias = b_ref[...] if extra is None else b_ref[...] + extra
            return acc + bias
        # per-tap path (also taken by the small-C self-test)
        acc = jnp.broadcast_to(b_ref[...], (nrows, C)).astype(jnp.float32)
        if extra is not None:
            acc = acc + extra
        for k, s in enumerate(shifts):
            acc = acc + jnp.dot(xin[s:s + nrows, :],
                                w_ref[k * C:(k + 1) * C, :],
                                preferred_element_type=jnp.float32)
        return acc

    # conv1 (dilation dil): h rows [t*TT - P2, t*TT + TT + P2)
    rows1 = TT + 2 * P2
    off1 = halo - P1 - P2
    h = conv(xlr, w1_ref, b1_ref, rows1, [off1 + k * dil for k in range(K)])

    # leaky_relu(h); rows outside [0, T) must be zero for conv2's 'same' pad.
    hb = h.astype(compute_dtype)
    hb = jnp.where(valid[halo - P2: halo - P2 + rows1], hb,
                   jnp.zeros((), compute_dtype))
    hlr = jnp.where(hb >= 0, hb, LRELU_SLOPE * hb)

    # conv2 (dilation 1) + bias + residual (residual = cur tile, no extra DMA).
    out = conv(hlr, w2_ref, b2_ref, TT, list(range(K)), extra=cur_ref[0])
    o_ref[0] = out.astype(o_ref.dtype)


def _vmem_limit_bytes(TT, C, K, halo):
    """Scoped-VMEM request derived from actual buffer sizes (v7x-safe cap)."""
    f32, b16 = 4, 2
    rows = TT + 2 * halo
    buf = 2 * TT * C * f32                       # current tile, double-buffered
    buf += 2 * 2 * halo * C * f32                # prev/next halo blocks
    buf += 2 * TT * C * f32                      # output tile
    buf += 2 * K * C * C * b16 + 2 * C * f32     # weights/biases, single-buffered
    buf += rows * C * (2 * f32 + 3 * b16)        # xlr / h / hlr temporaries
    buf += 2 * rows * K * C * b16                # fused-tap concatenations
    return int(min(48 * 2 ** 20, max(32 * 2 ** 20, 2 * buf)))


def _resblock_stage(x, w1, b1, w2, b2, dilation, *, tile_t, compute_dtype):
    """One fused (c1, c2, +residual) stage on (N, T, C)."""
    N, T, C = x.shape
    assert w1.shape[1] == C and w1.shape[0] % C == 0
    K = w1.shape[0] // C
    assert K % 2 == 1, "fused stage assumes odd kernel_size ('same' padding)"
    P1 = dilation * (K - 1) // 2
    P2 = (K - 1) // 2
    PH = P1 + P2
    halo = max(8, -(-PH // 8) * 8)               # sublane-aligned halo block
    assert T >= halo, "sequence too short for the halo-block scheme"

    TT = T if T <= tile_t else max(halo, (tile_t // halo) * halo)
    nT = pl.cdiv(T, TT)
    assert nT == 1 or TT % halo == 0, "time tile must be a multiple of halo"
    nH = pl.cdiv(T, halo)
    tt_h = max(TT // halo, 1)                    # time tile in halo-block units

    kernel = functools.partial(_resblock_stage_kernel, T=T, TT=TT, dil=dilation,
                               K=K, halo=halo, compute_dtype=compute_dtype)

    # Grid-constant weights/biases: single-buffer them (saves VMEM, esp. v7x).
    wspec = pl.BlockSpec((K * C, C), lambda t, n: (0, 0),
                         pipeline_mode=pl.Buffered(1))
    bspec = pl.BlockSpec((1, C), lambda t, n: (0, 0),
                         pipeline_mode=pl.Buffered(1))

    return pl.pallas_call(
        kernel,
        out_shape=jax.ShapeDtypeStruct((N, T, C), x.dtype),
        grid=(nT, N),                            # time tiles leading (megacore)
        in_specs=[
            # previous halo rows [t*TT - halo, t*TT)  (clamped; masked at t==0)
            pl.BlockSpec((1, halo, C),
                         lambda t, n: (n, jnp.maximum(t * tt_h - 1, 0), 0)),
            # current time tile (also serves as the residual)
            pl.BlockSpec((1, TT, C), lambda t, n: (n, t, 0)),
            # next halo rows [(t+1)*TT, (t+1)*TT + halo)  (clamped; masked > T)
            pl.BlockSpec((1, halo, C),
                         lambda t, n: (n, jnp.minimum((t + 1) * tt_h, nH - 1), 0)),
            wspec, bspec, wspec, bspec,
        ],
        out_specs=pl.BlockSpec((1, TT, C), lambda t, n: (n, t, 0)),
        compiler_params=pltpu.CompilerParams(
            dimension_semantics=("parallel", "parallel"),
            vmem_limit_bytes=_vmem_limit_bytes(TT, C, K, halo)),
    )(x, x, x, w1, b1, w2, b2)


def resblock_forward_ntc(x_ntc, prepared, *, dilations=(1, 3, 5), tile_t=512,
                         compute_dtype=jnp.bfloat16):
    """ResBlock forward on (N, T, C); use this inside an NTC generator."""
    x = x_ntc
    for (w1, b1, w2, b2), d in zip(prepared, dilations):
        x = _resblock_stage(x, w1, b1, w2, b2, d,
                            tile_t=tile_t, compute_dtype=compute_dtype)
    return x


def resblock_forward(x_ncl, prepared, *, dilations=(1, 3, 5), tile_t=512,
                     compute_dtype=jnp.bfloat16):
    """PyTorch-facing wrapper on (N, C, T).  In a full vocoder keep everything
    in NTC and call resblock_forward_ntc to avoid per-block transposes."""
    x = jnp.transpose(x_ncl, (0, 2, 1))
    x = resblock_forward_ntc(x, prepared, dilations=dilations, tile_t=tile_t,
                             compute_dtype=compute_dtype)
    return jnp.transpose(x, (0, 2, 1))


def make_params(key, channels, kernel_size=3, dilations=(1, 3, 5)):
    """Deterministic init mirroring the module: weights ~ N(0, 0.01)
    (init_weights); biases ~ U(-1/sqrt(C*K), 1/sqrt(C*K)) (Conv1d default).
    weight_norm at init reproduces the same effective weight, so it is folded.
    Weights stored as (K, Cin, Cout)."""
    params = {"convs1": [], "convs2": []}
    bound = 1.0 / (channels * kernel_size) ** 0.5
    for group in ("convs1", "convs2"):
        for _ in dilations:
            key, kw, kb = jax.random.split(key, 3)
            w = 0.01 * jax.random.normal(
                kw, (kernel_size, channels, channels), dtype=jnp.float32)
            b = jax.random.uniform(kb, (channels,), minval=-bound, maxval=bound,
                                   dtype=jnp.float32)
            params[group].append((w, b))
    return params


def prepare_params(params, dilations=(1, 3, 5), compute_dtype=jnp.bfloat16):
    """Hoisted weight prep: flatten to (K*C, C), cast to the MXU dtype once."""
    prepared = []
    for i, _ in enumerate(dilations):
        w1, b1 = params["convs1"][i]
        w2, b2 = params["convs2"][i]
        K, C, _ = w1.shape
        prepared.append((
            w1.reshape(K * C, C).astype(compute_dtype),
            b1.reshape(1, C).astype(jnp.float32),
            w2.reshape(K * C, C).astype(compute_dtype),
            b2.reshape(1, C).astype(jnp.float32),
        ))
    return prepared


def resblock_reference(x_ncl, params, dilations=(1, 3, 5)):
    """Pure-JAX f32 reference (lax.conv_general_dilated) for verification."""
    def lrelu(v):
        return jnp.where(v >= 0, v, LRELU_SLOPE * v)

    def conv(v, w, b, d):
        w_oik = jnp.transpose(w, (2, 1, 0))               # (Cout, Cin, K)
        pad = d * (w.shape[0] - 1) // 2
        out = lax.conv_general_dilated(
            v, w_oik, window_strides=(1,), padding=[(pad, pad)],
            rhs_dilation=(d,), dimension_numbers=("NCH", "OIH", "NCH"))
        return out + b[None, :, None]

    x = x_ncl
    for i, d in enumerate(dilations):
        w1, b1 = params["convs1"][i]
        w2, b2 = params["convs2"][i]
        xt = conv(lrelu(x), w1, b1, d)
        xt = conv(lrelu(xt), w2, b2, 1)
        x = xt + x
    return x


if __name__ == "__main__":
    key = jax.random.PRNGKey(0)
    dilations = (1, 3, 5)

    # (N, C, T, tile_t): small C exercises the per-tap path + partial last
    # tile; C=128 exercises the lane-fused K*C-contraction path.
    configs = ((2, 16, 48, 16), (2, 16, 40, 16), (1, 128, 64, 32))

    for (N, C, T, tile_t) in configs:
        key, kp, kx = jax.random.split(key, 3)
        params = make_params(kp, C)
        prepared = prepare_params(params, dilations)
        x = jax.random.normal(kx, (N, C, T), dtype=jnp.float32)

        fwd = jax.jit(functools.partial(resblock_forward,
                                        dilations=dilations, tile_t=tile_t))
        out = jax.block_until_ready(fwd(x, prepared))
        ref = resblock_reference(x, params, dilations)

        assert out.shape == (N, C, T)
        err = float(jnp.max(jnp.abs(out - ref)))
        # bf16 MXU inputs with f32 accumulation -> loosened tolerance.
        assert err < 2e-2, f"mismatch (N={N},C={C},T={T}): {err}"

    print("KERNEL_OK")
</pallas_src>

<mosaic_0001>
module attributes {stable_mosaic.version = 11 : i64} {
  func.func @_resblock_stage_kernel(%arg0: i32, %arg1: i32, %arg2: memref<1x8x16xf32, #tpu.memory_space<vmem>>, %arg3: memref<1x16x16xf32, #tpu.memory_space<vmem>>, %arg4: memref<1x8x16xf32, #tpu.memory_space<vmem>>, %arg5: memref<48x16xbf16, #tpu.memory_space<vmem>>, %arg6: memref<1x16xf32, #tpu.memory_space<vmem>>, %arg7: memref<48x16xbf16, #tpu.memory_space<vmem>>, %arg8: memref<1x16xf32, #tpu.memory_space<vmem>>, %arg9: memref<1x16x16xf32, #tpu.memory_space<vmem>>) attributes {dimension_semantics = [#tpu.dimension_semantics<parallel>, #tpu.dimension_semantics<parallel>], iteration_bounds = array<i64: 3, 2>, scalar_prefetch = 0 : i64, scratch_operands = 0 : i64, tpu.core_type = #tpu.core_type<tc>, window_params = [{transform_indices = @transform_0, window_bounds = array<i64: 1, 8, 16>}, {transform_indices = @transform_1, window_bounds = array<i64: 1, 16, 16>}, {transform_indices = @transform_2, window_bounds = array<i64: 1, 8, 16>}, {pipeline_mode = #tpu.pipeline_mode<synchronous>, transform_indices = @transform_3, window_bounds = array<i64: 48, 16>}, {pipeline_mode = #tpu.pipeline_mode<synchronous>, transform_indices = @transform_4, window_bounds = array<i64: 1, 16>}, {pipeline_mode = #tpu.pipeline_mode<synchronous>, transform_indices = @transform_5, window_bounds = array<i64: 48, 16>}, {pipeline_mode = #tpu.pipeline_mode<synchronous>, transform_indices = @transform_6, window_bounds = array<i64: 1, 16>}, {transform_indices = @transform_7, window_bounds = array<i64: 1, 16, 16>}]} {
    %c0 = arith.constant 0 : index
    %c0_0 = arith.constant 0 : index
    %c0_1 = arith.constant 0 : index
    %0 = vector.load %arg2[%c0, %c0_0, %c0_1] : memref<1x8x16xf32, #tpu.memory_space<vmem>>, vector<1x8x16xf32>
    %1 = vector.shape_cast %0 : vector<1x8x16xf32> to vector<8x16xf32>
    %c0_2 = arith.constant 0 : index
    %c0_3 = arith.constant 0 : index
    %c0_4 = arith.constant 0 : index
    %2 = vector.load %arg3[%c0_2, %c0_3, %c0_4] : memref<1x16x16xf32, #tpu.memory_space<vmem>>, vector<1x16x16xf32>
    %3 = vector.shape_cast %2 : vector<1x16x16xf32> to vector<16x16xf32>
    %c0_5 = arith.constant 0 : index
    %c0_6 = arith.constant 0 : index
    %c0_7 = arith.constant 0 : index
    %4 = vector.load %arg4[%c0_5, %c0_6, %c0_7] : memref<1x8x16xf32, #tpu.memory_space<vmem>>, vector<1x8x16xf32>
    %5 = vector.shape_cast %4 : vector<1x8x16xf32> to vector<8x16xf32>
    %6 = tpu.concatenate %1, %3, %5 in 0 : vector<8x16xf32>, vector<16x16xf32>, vector<8x16xf32> -> vector<32x16xf32>
    %7 = tpu.iota {dimensions = array<i32: 0>} : vector<32x1xi32>
    %c16_i32 = arith.constant 16 : i32
    %8 = arith.muli %arg0, %c16_i32 : i32
    %c8_i32 = arith.constant 8 : i32
    %9 = arith.subi %8, %c8_i32 : i32
    %10 = vector.broadcast %9 : i32 to vector<32x1xi32>
    %11 = arith.addi %7, %10 : vector<32x1xi32>
    %c0_i32 = arith.constant 0 : i32
    %12 = vector.broadcast %c0_i32 : i32 to vector<32x1xi32>
    %13 = arith.cmpi sge, %11, %12 : vector<32x1xi32>
    %c48_i32 = arith.constant 48 : i32
    %14 = vector.broadcast %c48_i32 : i32 to vector<32x1xi32>
    %15 = arith.cmpi slt, %11, %14 : vector<32x1xi32>
    %16 = arith.andi %13, %15 : vector<32x1xi1>
    %17 = arith.truncf %6 : vector<32x16xf32> to vector<32x16xbf16>
    %cst = arith.constant 0.000000e+00 : bf16
    %18 = vector.shape_cast %16 : vector<32x1xi1> to vector<32x1xi1>
    %19 = vector.broadcast %18 : vector<32x1xi1> to vector<32x16xi1>
    %20 = vector.broadcast %cst : bf16 to vector<32x16xbf16>
    %21 = arith.select %19, %17, %20 : vector<32x16xi1>, vector<32x16xbf16>
    %cst_8 = arith.constant 0.000000e+00 : bf16
    %22 = vector.broadcast %cst_8 : bf16 to vector<32x16xbf16>
    %23 = arith.cmpf oge, %21, %22 : vector<32x16xbf16>
    %cst_9 = arith.constant 1.000980e-01 : bf16
    %24 = vector.broadcast %cst_9 : bf16 to vector<32x16xbf16>
    %25 = arith.mulf %24, %21 : vector<32x16xbf16>
    %26 = arith.select %23, %21, %25 : vector<32x16xi1>, vector<32x16xbf16>
    %c0_10 = arith.constant 0 : index
    %c0_11 = arith.constant 0 : index
    %27 = vector.load %arg6[%c0_10, %c0_11] : memref<1x16xf32, #tpu.memory_space<vmem>>, vector<1x16xf32>
    %28 = vector.shape_cast %27 : vector<1x16xf32> to vector<1x16xf32>
    %29 = vector.broadcast %28 : vector<1x16xf32> to vector<18x16xf32>
    %30 = vector.extract_strided_slice %26 {offsets = [6, 0], sizes = [18, 16], strides = [1, 1]} : vector<32x16xbf16> to vector<18x16xbf16>
    %c0_12 = arith.constant 0 : index
    %c0_13 = arith.constant 0 : index
    %31 = vector.load %arg5[%c0_12, %c0_13] : memref<48x16xbf16, #tpu.memory_space<vmem>>, vector<16x16xbf16>
    %cst_14 = arith.constant dense<0.000000e+00> : vector<18x16xf32>
    %32 = tpu.matmul %30, %31, %cst_14 {dimension_numbers = #tpu.dot_dimension_numbers<[1], [0], [0], [1], [0, 0, 1, 1], [], []>} : vector<18x16xbf16>, vector<16x16xbf16>, vector<18x16xf32> -> vector<18x16xf32>
    %33 = arith.addf %29, %32 : vector<18x16xf32>
    %34 = vector.extract_strided_slice %26 {offsets = [7, 0], sizes = [18, 16], strides = [1, 1]} : vector<32x16xbf16> to vector<18x16xbf16>
    %c16 = arith.constant 16 : index
    %c0_15 = arith.constant 0 : index
    %35 = vector.load %arg5[%c16, %c0_15] : memref<48x16xbf16, #tpu.memory_space<vmem>>, vector<16x16xbf16>
    %cst_16 = arith.constant dense<0.000000e+00> : vector<18x16xf32>
    %36 = tpu.matmul %34, %35, %cst_16 {dimension_numbers = #tpu.dot_dimension_numbers<[1], [0], [0], [1], [0, 0, 1, 1], [], []>} : vector<18x16xbf16>, vector<16x16xbf16>, vector<18x16xf32> -> vector<18x16xf32>
    %37 = arith.addf %33, %36 : vector<18x16xf32>
    %38 = vector.extract_strided_slice %26 {offsets = [8, 0], sizes = [18, 16], strides = [1, 1]} : vector<32x16xbf16> to vector<18x16xbf16>
    %c32 = arith.constant 32 : index
    %c0_17 = arith.constant 0 : index
    %39 = vector.load %arg5[%c32, %c0_17] : memref<48x16xbf16, #tpu.memory_space<vmem>>, vector<16x16xbf16>
    %cst_18 = arith.constant dense<0.000000e+00> : vector<18x16xf32>
    %40 = tpu.matmul %38, %39, %cst_18 {dimension_numbers = #tpu.dot_dimension_numbers<[1], [0], [0], [1], [0, 0, 1, 1], [], []>} : vector<18x16xbf16>, vector<16x16xbf16>, vector<18x16xf32> -> vector<18x16xf32>
    %41 = arith.addf %37, %40 : vector<18x16xf32>
    %42 = arith.truncf %41 : vector<18x16xf32> to vector<18x16xbf16>
    %43 = vector.extract_strided_slice %16 {offsets = [7, 0], sizes = [18, 1], strides = [1, 1]} : vector<32x1xi1> to vector<18x1xi1>
    %cst_19 = arith.constant 0.000000e+00 : bf16
    %44 = vector.shape_cast %43 : vector<18x1xi1> to vector<18x1xi1>
    %45 = vector.broadcast %44 : vector<18x1xi1> to vector<18x16xi1>
    %46 = vector.broadcast %cst_19 : bf16 to vector<18x16xbf16>
    %47 = arith.select %45, %42, %46 : vector<18x16xi1>, vector<18x16xbf16>
    %cst_20 = arith.constant 0.000000e+00 : bf16
    %48 = vector.broadcast %cst_20 : bf16 to vector<18x16xbf16>
    %49 = arith.cmpf oge, %47, %48 : vector<18x16xbf16>
    %cst_21 = arith.constant 1.000980e-01 : bf16
    %50 = vector.broadcast %cst_21 : bf16 to vector<18x16xbf16>
    %51 = arith.mulf %50, %47 : vector<18x16xbf16>
    %52 = arith.select %49, %47, %51 : vector<18x16xi1>, vector<18x16xbf16>
    %c0_22 = arith.constant 0 : index
    %c0_23 = arith.constant 0 : index
    %c0_24 = arith.constant 0 : index
    %53 = vector.load %arg3[%c0_22, %c0_23, %c0_24] : memref<1x16x16xf32, #tpu.memory_space<vmem>>, vector<1x16x16xf32>
    %54 = vector.shape_cast %53 : vector<1x16x16xf32> to vector<16x16xf32>
    %c0_25 = arith.constant 0 : index
    %c0_26 = arith.constant 0 : index
    %55 = vector.load %arg8[%c0_25, %c0_26] : memref<1x16xf32, #tpu.memory_space<vmem>>, vector<1x16xf32>
    %56 = vector.shape_cast %55 : vector<1x16xf32> to vector<1x16xf32>
    %57 = vector.broadcast %56 : vector<1x16xf32> to vector<16x16xf32>
    %58 = arith.addf %57, %54 : vector<16x16xf32>
    %59 = vector.extract_strided_slice %52 {offsets = [0, 0], sizes = [16, 16], strides = [1, 1]} : vector<18x16xbf16> to vector<16x16xbf16>
    %c0_27 = arith.constant 0 : index
    %c0_28 = arith.constant 0 : index
    %60 = vector.load %arg7[%c0_27, %c0_28] : memref<48x16xbf16, #tpu.memory_space<vmem>>, vector<16x16xbf16>
    %cst_29 = arith.constant dense<0.000000e+00> : vector<16x16xf32>
    %61 = tpu.matmul %59, %60, %cst_29 {dimension_numbers = #tpu.dot_dimension_numbers<[1], [0], [0], [1], [0, 0, 1, 1], [], []>} : vector<16x16xbf16>, vector<16x16xbf16>, vector<16x16xf32> -> vector<16x16xf32>
    %62 = arith.addf %58, %61 : vector<16x16xf32>
    %63 = vector.extract_strided_slice %52 {offsets = [1, 0], sizes = [16, 16], strides = [1, 1]} : vector<18x16xbf16> to vector<16x16xbf16>
    %c16_30 = arith.constant 16 : index
    %c0_31 = arith.constant 0 : index
    %64 = vector.load %arg7[%c16_30, %c0_31] : memref<48x16xbf16, #tpu.memory_space<vmem>>, vector<16x16xbf16>
    %cst_32 = arith.constant dense<0.000000e+00> : vector<16x16xf32>
    %65 = tpu.matmul %63, %64, %cst_32 {dimension_numbers = #tpu.dot_dimension_numbers<[1], [0], [0], [1], [0, 0, 1, 1], [], []>} : vector<16x16xbf16>, vector<16x16xbf16>, vector<16x16xf32> -> vector<16x16xf32>
    %66 = arith.addf %62, %65 : vector<16x16xf32>
    %67 = vector.extract_strided_slice %52 {offsets = [2, 0], sizes = [16, 16], strides = [1, 1]} : vector<18x16xbf16> to vector<16x16xbf16>
    %c32_33 = arith.constant 32 : index
    %c0_34 = arith.constant 0 : index
    %68 = vector.load %arg7[%c32_33, %c0_34] : memref<48x16xbf16, #tpu.memory_space<vmem>>, vector<16x16xbf16>
    %cst_35 = arith.constant dense<0.000000e+00> : vector<16x16xf32>
    %69 = tpu.matmul %67, %68, %cst_35 {dimension_numbers = #tpu.dot_dimension_numbers<[1], [0], [0], [1], [0, 0, 1, 1], [], []>} : vector<16x16xbf16>, vector<16x16xbf16>, vector<16x16xf32> -> vector<16x16xf32>
    %70 = arith.addf %66, %69 : vector<16x16xf32>
    %c0_36 = arith.constant 0 : index
    %c0_37 = arith.constant 0 : index
    %c0_38 = arith.constant 0 : index
    %71 = vector.load %arg9[%c0_36, %c0_37, %c0_38] : memref<1x16x16xf32, #tpu.memory_space<vmem>>, vector<1x16x16xf32>
    %72 = vector.shape_cast %71 : vector<1x16x16xf32> to vector<16x16xf32>
    %73 = vector.shape_cast %70 : vector<16x16xf32> to vector<1x16x16xf32>
    tpu.vector_store %arg9[%c0_36, %c0_37, %c0_38], %73 {strides = array<i32>} : memref<1x16x16xf32, #tpu.memory_space<vmem>>, vector<1x16x16xf32>,
    return
  }
  func.func @transform_0(%arg0: i32, %arg1: i32) -> (i32, i32, i32) {
    %c2_i32 = arith.constant 2 : i32
    %0 = arith.muli %arg0, %c2_i32 : i32
    %c1_i32 = arith.constant 1 : i32
    %1 = arith.subi %0, %c1_i32 : i32
    %c0_i32 = arith.constant 0 : i32
    %2 = arith.maxsi %1, %c0_i32 : i32
    %c0_i32_0 = arith.constant 0 : i32
    %c0_i32_1 = arith.constant 0 : i32
    return %arg1, %2, %c0_i32_0 : i32, i32, i32
  }
  func.func @transform_1(%arg0: i32, %arg1: i32) -> (i32, i32, i32) {
    %c0_i32 = arith.constant 0 : i32
    %c0_i32_0 = arith.constant 0 : i32
    return %arg1, %arg0, %c0_i32 : i32, i32, i32
  }
  func.func @transform_2(%arg0: i32, %arg1: i32) -> (i32, i32, i32) {
    %c1_i32 = arith.constant 1 : i32
    %0 = arith.addi %arg0, %c1_i32 : i32
    %c2_i32 = arith.constant 2 : i32
    %1 = arith.muli %0, %c2_i32 : i32
    %c5_i32 = arith.constant 5 : i32
    %2 = arith.minsi %1, %c5_i32 : i32
    %c0_i32 = arith.constant 0 : i32
    %c0_i32_0 = arith.constant 0 : i32
    return %arg1, %2, %c0_i32 : i32, i32, i32
  }
  func.func @transform_3(%arg0: i32, %arg1: i32) -> (i32, i32) {
    %c0_i32 = arith.constant 0 : i32
    %c0_i32_0 = arith.constant 0 : i32
    %c0_i32_1 = arith.constant 0 : i32
    return %c0_i32, %c0_i32_0 : i32, i32
  }
  func.func @transform_4(%arg0: i32, %arg1: i32) -> (i32, i32) {
    %c0_i32 = arith.constant 0 : i32
    %c0_i32_0 = arith.constant 0 : i32
    %c0_i32_1 = arith.constant 0 : i32
    return %c0_i32, %c0_i32_0 : i32, i32
  }
  func.func @transform_5(%arg0: i32, %arg1: i32) -> (i32, i32) {
    %c0_i32 = arith.constant 0 : i32
    %c0_i32_0 = arith.constant 0 : i32
    %c0_i32_1 = arith.constant 0 : i32
    return %c0_i32, %c0_i32_0 : i32, i32
  }
  func.func @transform_6(%arg0: i32, %arg1: i32) -> (i32, i32) {
    %c0_i32 = arith.constant 0 : i32
    %c0_i32_0 = arith.constant 0 : i32
    %c0_i32_1 = arith.constant 0 : i32
    return %c0_i32, %c0_i32_0 : i32, i32
  }
  func.func @transform_7(%arg0: i32, %arg1: i32) -> (i32, i32, i32) {
    %c0_i32 = arith.constant 0 : i32
    %c0_i32_0 = arith.constant 0 : i32
    return %arg1, %arg0, %c0_i32 : i32, i32, i32
  }
}

module attributes {stable_mosaic.version = 11 : i64} {
  func.func @_resblock_stage_kernel(%arg0: i32, %arg1: i32, %arg2: memref<1x8x16xf32, #tpu.memory_space<vmem>>, %arg3: memref<1x16x16xf32, #tpu.memory_space<vmem>>, %arg4: memref<1x8x16xf32, #tpu.memory_space<vmem>>, %arg5: memref<48x16xbf16, #tpu.memory_space<vmem>>, %arg6: memref<1x16xf32, #tpu.memory_space<vmem>>, %arg7: memref<48x16xbf16, #tpu.memory_space<vmem>>, %arg8: memref<1x16xf32, #tpu.memory_space<vmem>>, %arg9: memref<1x16x16xf32, #tpu.memory_space<vmem>>) attributes {dimension_semantics = [#tpu.dimension_semantics<parallel>, #tpu.dimension_semantics<parallel>], iteration_bounds = array<i64: 3, 2>, scalar_prefetch = 0 : i64, scratch_operands = 0 : i64, tpu.core_type = #tpu.core_type<tc>, window_params = [{transform_indices = @transform_0, window_bounds = array<i64: 1, 8, 16>}, {transform_indices = @transform_1, window_bounds = array<i64: 1, 16, 16>}, {transform_indices = @transform_2, window_bounds = array<i64: 1, 8, 16>}, {pipeline_mode = #tpu.pipeline_mode<synchronous>, transform_indices = @transform_3, window_bounds = array<i64: 48, 16>}, {pipeline_mode = #tpu.pipeline_mode<synchronous>, transform_indices = @transform_4, window_bounds = array<i64: 1, 16>}, {pipeline_mode = #tpu.pipeline_mode<synchronous>, transform_indices = @transform_5, window_bounds = array<i64: 48, 16>}, {pipeline_mode = #tpu.pipeline_mode<synchronous>, transform_indices = @transform_6, window_bounds = array<i64: 1, 16>}, {transform_indices = @transform_7, window_bounds = array<i64: 1, 16, 16>}]} {
    %c0 = arith.constant 0 : index
    %c0_0 = arith.constant 0 : index
    %c0_1 = arith.constant 0 : index
    %0 = vector.load %arg2[%c0, %c0_0, %c0_1] : memref<1x8x16xf32, #tpu.memory_space<vmem>>, vector<1x8x16xf32>
    %1 = vector.shape_cast %0 : vector<1x8x16xf32> to vector<8x16xf32>
    %c0_2 = arith.constant 0 : index
    %c0_3 = arith.constant 0 : index
    %c0_4 = arith.constant 0 : index
    %2 = vector.load %arg3[%c0_2, %c0_3, %c0_4] : memref<1x16x16xf32, #tpu.memory_space<vmem>>, vector<1x16x16xf32>
    %3 = vector.shape_cast %2 : vector<1x16x16xf32> to vector<16x16xf32>
    %c0_5 = arith.constant 0 : index
    %c0_6 = arith.constant 0 : index
    %c0_7 = arith.constant 0 : index
    %4 = vector.load %arg4[%c0_5, %c0_6, %c0_7] : memref<1x8x16xf32, #tpu.memory_space<vmem>>, vector<1x8x16xf32>
    %5 = vector.shape_cast %4 : vector<1x8x16xf32> to vector<8x16xf32>
    %6 = tpu.concatenate %1, %3, %5 in 0 : vector<8x16xf32>, vector<16x16xf32>, vector<8x16xf32> -> vector<32x16xf32>
    %7 = tpu.iota {dimensions = array<i32: 0>} : vector<32x1xi32>
    %c16_i32 = arith.constant 16 : i32
    %8 = arith.muli %arg0, %c16_i32 : i32
    %c8_i32 = arith.constant 8 : i32
    %9 = arith.subi %8, %c8_i32 : i32
    %10 = vector.broadcast %9 : i32 to vector<32x1xi32>
    %11 = arith.addi %7, %10 : vector<32x1xi32>
    %c0_i32 = arith.constant 0 : i32
    %12 = vector.broadcast %c0_i32 : i32 to vector<32x1xi32>
    %13 = arith.cmpi sge, %11, %12 : vector<32x1xi32>
    %c48_i32 = arith.constant 48 : i32
    %14 = vector.broadcast %c48_i32 : i32 to vector<32x1xi32>
    %15 = arith.cmpi slt, %11, %14 : vector<32x1xi32>
    %16 = arith.andi %13, %15 : vector<32x1xi1>
    %17 = arith.truncf %6 : vector<32x16xf32> to vector<32x16xbf16>
    %cst = arith.constant 0.000000e+00 : bf16
    %18 = vector.shape_cast %16 : vector<32x1xi1> to vector<32x1xi1>
    %19 = vector.broadcast %18 : vector<32x1xi1> to vector<32x16xi1>
    %20 = vector.broadcast %cst : bf16 to vector<32x16xbf16>
    %21 = arith.select %19, %17, %20 : vector<32x16xi1>, vector<32x16xbf16>
    %cst_8 = arith.constant 0.000000e+00 : bf16
    %22 = vector.broadcast %cst_8 : bf16 to vector<32x16xbf16>
    %23 = arith.cmpf oge, %21, %22 : vector<32x16xbf16>
    %cst_9 = arith.constant 1.000980e-01 : bf16
    %24 = vector.broadcast %cst_9 : bf16 to vector<32x16xbf16>
    %25 = arith.mulf %24, %21 : vector<32x16xbf16>
    %26 = arith.select %23, %21, %25 : vector<32x16xi1>, vector<32x16xbf16>
    %c0_10 = arith.constant 0 : index
    %c0_11 = arith.constant 0 : index
    %27 = vector.load %arg6[%c0_10, %c0_11] : memref<1x16xf32, #tpu.memory_space<vmem>>, vector<1x16xf32>
    %28 = vector.shape_cast %27 : vector<1x16xf32> to vector<1x16xf32>
    %29 = vector.broadcast %28 : vector<1x16xf32> to vector<18x16xf32>
    %30 = vector.extract_strided_slice %26 {offsets = [4, 0], sizes = [18, 16], strides = [1, 1]} : vector<32x16xbf16> to vector<18x16xbf16>
    %c0_12 = arith.constant 0 : index
    %c0_13 = arith.constant 0 : index
    %31 = vector.load %arg5[%c0_12, %c0_13] : memref<48x16xbf16, #tpu.memory_space<vmem>>, vector<16x16xbf16>
    %cst_14 = arith.constant dense<0.000000e+00> : vector<18x16xf32>
    %32 = tpu.matmul %30, %31, %cst_14 {dimension_numbers = #tpu.dot_dimension_numbers<[1], [0], [0], [1], [0, 0, 1, 1], [], []>} : vector<18x16xbf16>, vector<16x16xbf16>, vector<18x16xf32> -> vector<18x16xf32>
    %33 = arith.addf %29, %32 : vector<18x16xf32>
    %34 = vector.extract_strided_slice %26 {offsets = [7, 0], sizes = [18, 16], strides = [1, 1]} : vector<32x16xbf16> to vector<18x16xbf16>
    %c16 = arith.constant 16 : index
    %c0_15 = arith.constant 0 : index
    %35 = vector.load %arg5[%c16, %c0_15] : memref<48x16xbf16, #tpu.memory_space<vmem>>, vector<16x16xbf16>
    %cst_16 = arith.constant dense<0.000000e+00> : vector<18x16xf32>
    %36 = tpu.matmul %34, %35, %cst_16 {dimension_numbers = #tpu.dot_dimension_numbers<[1], [0], [0], [1], [0, 0, 1, 1], [], []>} : vector<18x16xbf16>, vector<16x16xbf16>, vector<18x16xf32> -> vector<18x16xf32>
    %37 = arith.addf %33, %36 : vector<18x16xf32>
    %38 = vector.extract_strided_slice %26 {offsets = [10, 0], sizes = [18, 16], strides = [1, 1]} : vector<32x16xbf16> to vector<18x16xbf16>
    %c32 = arith.constant 32 : index
    %c0_17 = arith.constant 0 : index
    %39 = vector.load %arg5[%c32, %c0_17] : memref<48x16xbf16, #tpu.memory_space<vmem>>, vector<16x16xbf16>
    %cst_18 = arith.constant dense<0.000000e+00> : vector<18x16xf32>
    %40 = tpu.matmul %38, %39, %cst_18 {dimension_numbers = #tpu.dot_dimension_numbers<[1], [0], [0], [1], [0, 0, 1, 1], [], []>} : vector<18x16xbf16>, vector<16x16xbf16>, vector<18x16xf32> -> vector<18x16xf32>
    %41 = arith.addf %37, %40 : vector<18x16xf32>
    %42 = arith.truncf %41 : vector<18x16xf32> to vector<18x16xbf16>
    %43 = vector.extract_strided_slice %16 {offsets = [7, 0], sizes = [18, 1], strides = [1, 1]} : vector<32x1xi1> to vector<18x1xi1>
    %cst_19 = arith.constant 0.000000e+00 : bf16
    %44 = vector.shape_cast %43 : vector<18x1xi1> to vector<18x1xi1>
    %45 = vector.broadcast %44 : vector<18x1xi1> to vector<18x16xi1>
    %46 = vector.broadcast %cst_19 : bf16 to vector<18x16xbf16>
    %47 = arith.select %45, %42, %46 : vector<18x16xi1>, vector<18x16xbf16>
    %cst_20 = arith.constant 0.000000e+00 : bf16
    %48 = vector.broadcast %cst_20 : bf16 to vector<18x16xbf16>
    %49 = arith.cmpf oge, %47, %48 : vector<18x16xbf16>
    %cst_21 = arith.constant 1.000980e-01 : bf16
    %50 = vector.broadcast %cst_21 : bf16 to vector<18x16xbf16>
    %51 = arith.mulf %50, %47 : vector<18x16xbf16>
    %52 = arith.select %49, %47, %51 : vector<18x16xi1>, vector<18x16xbf16>
    %c0_22 = arith.constant 0 : index
    %c0_23 = arith.constant 0 : index
    %c0_24 = arith.constant 0 : index
    %53 = vector.load %arg3[%c0_22, %c0_23, %c0_24] : memref<1x16x16xf32, #tpu.memory_space<vmem>>, vector<1x16x16xf32>
    %54 = vector.shape_cast %53 : vector<1x16x16xf32> to vector<16x16xf32>
    %c0_25 = arith.constant 0 : index
    %c0_26 = arith.constant 0 : index
    %55 = vector.load %arg8[%c0_25, %c0_26] : memref<1x16xf32, #tpu.memory_space<vmem>>, vector<1x16xf32>
    %56 = vector.shape_cast %55 : vector<1x16xf32> to vector<1x16xf32>
    %57 = vector.broadcast %56 : vector<1x16xf32> to vector<16x16xf32>
    %58 = arith.addf %57, %54 : vector<16x16xf32>
    %59 = vector.extract_strided_slice %52 {offsets = [0, 0], sizes = [16, 16], strides = [1, 1]} : vector<18x16xbf16> to vector<16x16xbf16>
    %c0_27 = arith.constant 0 : index
    %c0_28 = arith.constant 0 : index
    %60 = vector.load %arg7[%c0_27, %c0_28] : memref<48x16xbf16, #tpu.memory_space<vmem>>, vector<16x16xbf16>
    %cst_29 = arith.constant dense<0.000000e+00> : vector<16x16xf32>
    %61 = tpu.matmul %59, %60, %cst_29 {dimension_numbers = #tpu.dot_dimension_numbers<[1], [0], [0], [1], [0, 0, 1, 1], [], []>} : vector<16x16xbf16>, vector<16x16xbf16>, vector<16x16xf32> -> vector<16x16xf32>
    %62 = arith.addf %58, %61 : vector<16x16xf32>
    %63 = vector.extract_strided_slice %52 {offsets = [1, 0], sizes = [16, 16], strides = [1, 1]} : vector<18x16xbf16> to vector<16x16xbf16>
    %c16_30 = arith.constant 16 : index
    %c0_31 = arith.constant 0 : index
    %64 = vector.load %arg7[%c16_30, %c0_31] : memref<48x16xbf16, #tpu.memory_space<vmem>>, vector<16x16xbf16>
    %cst_32 = arith.constant dense<0.000000e+00> : vector<16x16xf32>
    %65 = tpu.matmul %63, %64, %cst_32 {dimension_numbers = #tpu.dot_dimension_numbers<[1], [0], [0], [1], [0, 0, 1, 1], [], []>} : vector<16x16xbf16>, vector<16x16xbf16>, vector<16x16xf32> -> vector<16x16xf32>
    %66 = arith.addf %62, %65 : vector<16x16xf32>
    %67 = vector.extract_strided_slice %52 {offsets = [2, 0], sizes = [16, 16], strides = [1, 1]} : vector<18x16xbf16> to vector<16x16xbf16>
    %c32_33 = arith.constant 32 : index
    %c0_34 = arith.constant 0 : index
    %68 = vector.load %arg7[%c32_33, %c0_34] : memref<48x16xbf16, #tpu.memory_space<vmem>>, vector<16x16xbf16>
    %cst_35 = arith.constant dense<0.000000e+00> : vector<16x16xf32>
    %69 = tpu.matmul %67, %68, %cst_35 {dimension_numbers = #tpu.dot_dimension_numbers<[1], [0], [0], [1], [0, 0, 1, 1], [], []>} : vector<16x16xbf16>, vector<16x16xbf16>, vector<16x16xf32> -> vector<16x16xf32>
    %70 = arith.addf %66, %69 : vector<16x16xf32>
    %c0_36 = arith.constant 0 : index
    %c0_37 = arith.constant 0 : index
    %c0_38 = arith.constant 0 : index
    %71 = vector.load %arg9[%c0_36, %c0_37, %c0_38] : memref<1x16x16xf32, #tpu.memory_space<vmem>>, vector<1x16x16xf32>
    %72 = vector.shape_cast %71 : vector<1x16x16xf32> to vector<16x16xf32>
    %73 = vector.shape_cast %70 : vector<16x16xf32> to vector<1x16x16xf32>
    tpu.vector_store %arg9[%c0_36, %c0_37, %c0_38], %73 {strides = array<i32>} : memref<1x16x16xf32, #tpu.memory_space<vmem>>, vector<1x16x16xf32>,
    return
  }
  func.func @transform_0(%arg0: i32, %arg1: i32) -> (i32, i32, i32) {
    %c2_i32 = arith.constant 2 : i32
    %0 = arith.muli %arg0, %c2_i32 : i32
    %c1_i32 = arith.constant 1 : i32
    %1 = arith.subi %0, %c1_i32 : i32
    %c0_i32 = arith.constant 0 : i32
    %2 = arith.maxsi %1, %c0_i32 : i32
    %c0_i32_0 = arith.constant 0 : i32
    %c0_i32_1 = arith.constant 0 : i32
    return %arg1, %2, %c0_i32_0 : i32, i32, i32
  }
  func.func @transform_1(%arg0: i32, %arg1: i32) -> (i32, i32, i32) {
    %c0_i32 = arith.constant 0 : i32
    %c0_i32_0 = arith.constant 0 : i32
    return %arg1, %arg0, %c0_i32 : i32, i32, i32
  }
  func.func @transform_2(%arg0: i32, %arg1: i32) -> (i32, i32, i32) {
    %c1_i32 = arith.constant 1 : i32
    %0 = arith.addi %arg0, %c1_i32 : i32
    %c2_i32 = arith.constant 2 : i32
    %1 = arith.muli %0, %c2_i32 : i32
    %c5_i32 = arith.constant 5 : i32
    %2 = arith.minsi %1, %c5_i32 : i32
    %c0_i32 = arith.constant 0 : i32
    %c0_i32_0 = arith.constant 0 : i32
    return %arg1, %2, %c0_i32 : i32, i32, i32
  }
  func.func @transform_3(%arg0: i32, %arg1: i32) -> (i32, i32) {
    %c0_i32 = arith.constant 0 : i32
    %c0_i32_0 = arith.constant 0 : i32
    %c0_i32_1 = arith.constant 0 : i32
    return %c0_i32, %c0_i32_0 : i32, i32
  }
  func.func @transform_4(%arg0: i32, %arg1: i32) -> (i32, i32) {
    %c0_i32 = arith.constant 0 : i32
    %c0_i32_0 = arith.constant 0 : i32
    %c0_i32_1 = arith.constant 0 : i32
    return %c0_i32, %c0_i32_0 : i32, i32
  }
  func.func @transform_5(%arg0: i32, %arg1: i32) -> (i32, i32) {
    %c0_i32 = arith.constant 0 : i32
    %c0_i32_0 = arith.constant 0 : i32
    %c0_i32_1 = arith.constant 0 : i32
    return %c0_i32, %c0_i32_0 : i32, i32
  }
  func.func @transform_6(%arg0: i32, %arg1: i32) -> (i32, i32) {
    %c0_i32 = arith.constant 0 : i32
    %c0_i32_0 = arith.constant 0 : i32
    %c0_i32_1 = arith.constant 0 : i32
    return %c0_i32, %c0_i32_0 : i32, i32
  }
  func.func @transform_7(%arg0: i32, %arg1: i32) -> (i32, i32, i32) {
    %c0_i32 = arith.constant 0 : i32
    %c0_i32_0 = arith.constant 0 : i32
    return %arg1, %arg0, %c0_i32 : i32, i32, i32
  }
}

module attributes {stable_mosaic.version = 11 : i64} {
  func.func @_resblock_stage_kernel(%arg0: i32, %arg1: i32, %arg2: memref<1x8x16xf32, #tpu.memory_space<vmem>>, %arg3: memref<1x16x16xf32, #tpu.memory_space<vmem>>, %arg4: memref<1x8x16xf32, #tpu.memory_space<vmem>>, %arg5: memref<48x16xbf16, #tpu.memory_space<vmem>>, %arg6: memref<1x16xf32, #tpu.memory_space<vmem>>, %arg7: memref<48x16xbf16, #tpu.memory_space<vmem>>, %arg8: memref<1x16xf32, #tpu.memory_space<vmem>>, %arg9: memref<1x16x16xf32, #tpu.memory_space<vmem>>) attributes {dimension_semantics = [#tpu.dimension_semantics<parallel>, #tpu.dimension_semantics<parallel>], iteration_bounds = array<i64: 3, 2>, scalar_prefetch = 0 : i64, scratch_operands = 0 : i64, tpu.core_type = #tpu.core_type<tc>, window_params = [{transform_indices = @transform_0, window_bounds = array<i64: 1, 8, 16>}, {transform_indices = @transform_1, window_bounds = array<i64: 1, 16, 16>}, {transform_indices = @transform_2, window_bounds = array<i64: 1, 8, 16>}, {pipeline_mode = #tpu.pipeline_mode<synchronous>, transform_indices = @transform_3, window_bounds = array<i64: 48, 16>}, {pipeline_mode = #tpu.pipeline_mode<synchronous>, transform_indices = @transform_4, window_bounds = array<i64: 1, 16>}, {pipeline_mode = #tpu.pipeline_mode<synchronous>, transform_indices = @transform_5, window_bounds = array<i64: 48, 16>}, {pipeline_mode = #tpu.pipeline_mode<synchronous>, transform_indices = @transform_6, window_bounds = array<i64: 1, 16>}, {transform_indices = @transform_7, window_bounds = array<i64: 1, 16, 16>}]} {
    %c0 = arith.constant 0 : index
    %c0_0 = arith.constant 0 : index
    %c0_1 = arith.constant 0 : index
    %0 = vector.load %arg2[%c0, %c0_0, %c0_1] : memref<1x8x16xf32, #tpu.memory_space<vmem>>, vector<1x8x16xf32>
    %1 = vector.shape_cast %0 : vector<1x8x16xf32> to vector<8x16xf32>
    %c0_2 = arith.constant 0 : index
    %c0_3 = arith.constant 0 : index
    %c0_4 = arith.constant 0 : index
    %2 = vector.load %arg3[%c0_2, %c0_3, %c0_4] : memref<1x16x16xf32, #tpu.memory_space<vmem>>, vector<1x16x16xf32>
    %3 = vector.shape_cast %2 : vector<1x16x16xf32> to vector<16x16xf32>
    %c0_5 = arith.constant 0 : index
    %c0_6 = arith.constant 0 : index
    %c0_7 = arith.constant 0 : index
    %4 = vector.load %arg4[%c0_5, %c0_6, %c0_7] : memref<1x8x16xf32, #tpu.memory_space<vmem>>, vector<1x8x16xf32>
    %5 = vector.shape_cast %4 : vector<1x8x16xf32> to vector<8x16xf32>
    %6 = tpu.concatenate %1, %3, %5 in 0 : vector<8x16xf32>, vector<16x16xf32>, vector<8x16xf32> -> vector<32x16xf32>
    %7 = tpu.iota {dimensions = array<i32: 0>} : vector<32x1xi32>
    %c16_i32 = arith.constant 16 : i32
    %8 = arith.muli %arg0, %c16_i32 : i32
    %c8_i32 = arith.constant 8 : i32
    %9 = arith.subi %8, %c8_i32 : i32
    %10 = vector.broadcast %9 : i32 to vector<32x1xi32>
    %11 = arith.addi %7, %10 : vector<32x1xi32>
    %c0_i32 = arith.constant 0 : i32
    %12 = vector.broadcast %c0_i32 : i32 to vector<32x1xi32>
    %13 = arith.cmpi sge, %11, %12 : vector<32x1xi32>
    %c48_i32 = arith.constant 48 : i32
    %14 = vector.broadcast %c48_i32 : i32 to vector<32x1xi32>
    %15 = arith.cmpi slt, %11, %14 : vector<32x1xi32>
    %16 = arith.andi %13, %15 : vector<32x1xi1>
    %17 = arith.truncf %6 : vector<32x16xf32> to vector<32x16xbf16>
    %cst = arith.constant 0.000000e+00 : bf16
    %18 = vector.shape_cast %16 : vector<32x1xi1> to vector<32x1xi1>
    %19 = vector.broadcast %18 : vector<32x1xi1> to vector<32x16xi1>
    %20 = vector.broadcast %cst : bf16 to vector<32x16xbf16>
    %21 = arith.select %19, %17, %20 : vector<32x16xi1>, vector<32x16xbf16>
    %cst_8 = arith.constant 0.000000e+00 : bf16
    %22 = vector.broadcast %cst_8 : bf16 to vector<32x16xbf16>
    %23 = arith.cmpf oge, %21, %22 : vector<32x16xbf16>
    %cst_9 = arith.constant 1.000980e-01 : bf16
    %24 = vector.broadcast %cst_9 : bf16 to vector<32x16xbf16>
    %25 = arith.mulf %24, %21 : vector<32x16xbf16>
    %26 = arith.select %23, %21, %25 : vector<32x16xi1>, vector<32x16xbf16>
    %c0_10 = arith.constant 0 : index
    %c0_11 = arith.constant 0 : index
    %27 = vector.load %arg6[%c0_10, %c0_11] : memref<1x16xf32, #tpu.memory_space<vmem>>, vector<1x16xf32>
    %28 = vector.shape_cast %27 : vector<1x16xf32> to vector<1x16xf32>
    %29 = vector.broadcast %28 : vector<1x16xf32> to vector<18x16xf32>
    %30 = vector.extract_strided_slice %26 {offsets = [2, 0], sizes = [18, 16], strides = [1, 1]} : vector<32x16xbf16> to vector<18x16xbf16>
    %c0_12 = arith.constant 0 : index
    %c0_13 = arith.constant 0 : index
    %31 = vector.load %arg5[%c0_12, %c0_13] : memref<48x16xbf16, #tpu.memory_space<vmem>>, vector<16x16xbf16>
    %cst_14 = arith.constant dense<0.000000e+00> : vector<18x16xf32>
    %32 = tpu.matmul %30, %31, %cst_14 {dimension_numbers = #tpu.dot_dimension_numbers<[1], [0], [0], [1], [0, 0, 1, 1], [], []>} : vector<18x16xbf16>, vector<16x16xbf16>, vector<18x16xf32> -> vector<18x16xf32>
    %33 = arith.addf %29, %32 : vector<18x16xf32>
    %34 = vector.extract_strided_slice %26 {offsets = [7, 0], sizes = [18, 16], strides = [1, 1]} : vector<32x16xbf16> to vector<18x16xbf16>
    %c16 = arith.constant 16 : index
    %c0_15 = arith.constant 0 : index
    %35 = vector.load %arg5[%c16, %c0_15] : memref<48x16xbf16, #tpu.memory_space<vmem>>, vector<16x16xbf16>
    %cst_16 = arith.constant dense<0.000000e+00> : vector<18x16xf32>
    %36 = tpu.matmul %34, %35, %cst_16 {dimension_numbers = #tpu.dot_dimension_numbers<[1], [0], [0], [1], [0, 0, 1, 1], [], []>} : vector<18x16xbf16>, vector<16x16xbf16>, vector<18x16xf32> -> vector<18x16xf32>
    %37 = arith.addf %33, %36 : vector<18x16xf32>
    %38 = vector.extract_strided_slice %26 {offsets = [12, 0], sizes = [18, 16], strides = [1, 1]} : vector<32x16xbf16> to vector<18x16xbf16>
    %c32 = arith.constant 32 : index
    %c0_17 = arith.constant 0 : index
    %39 = vector.load %arg5[%c32, %c0_17] : memref<48x16xbf16, #tpu.memory_space<vmem>>, vector<16x16xbf16>
    %cst_18 = arith.constant dense<0.000000e+00> : vector<18x16xf32>
    %40 = tpu.matmul %38, %39, %cst_18 {dimension_numbers = #tpu.dot_dimension_numbers<[1], [0], [0], [1], [0, 0, 1, 1], [], []>} : vector<18x16xbf16>, vector<16x16xbf16>, vector<18x16xf32> -> vector<18x16xf32>
    %41 = arith.addf %37, %40 : vector<18x16xf32>
    %42 = arith.truncf %41 : vector<18x16xf32> to vector<18x16xbf16>
    %43 = vector.extract_strided_slice %16 {offsets = [7, 0], sizes = [18, 1], strides = [1, 1]} : vector<32x1xi1> to vector<18x1xi1>
    %cst_19 = arith.constant 0.000000e+00 : bf16
    %44 = vector.shape_cast %43 : vector<18x1xi1> to vector<18x1xi1>
    %45 = vector.broadcast %44 : vector<18x1xi1> to vector<18x16xi1>
    %46 = vector.broadcast %cst_19 : bf16 to vector<18x16xbf16>
    %47 = arith.select %45, %42, %46 : vector<18x16xi1>, vector<18x16xbf16>
    %cst_20 = arith.constant 0.000000e+00 : bf16
    %48 = vector.broadcast %cst_20 : bf16 to vector<18x16xbf16>
    %49 = arith.cmpf oge, %47, %48 : vector<18x16xbf16>
    %cst_21 = arith.constant 1.000980e-01 : bf16
    %50 = vector.broadcast %cst_21 : bf16 to vector<18x16xbf16>
    %51 = arith.mulf %50, %47 : vector<18x16xbf16>
    %52 = arith.select %49, %47, %51 : vector<18x16xi1>, vector<18x16xbf16>
    %c0_22 = arith.constant 0 : index
    %c0_23 = arith.constant 0 : index
    %c0_24 = arith.constant 0 : index
    %53 = vector.load %arg3[%c0_22, %c0_23, %c0_24] : memref<1x16x16xf32, #tpu.memory_space<vmem>>, vector<1x16x16xf32>
    %54 = vector.shape_cast %53 : vector<1x16x16xf32> to vector<16x16xf32>
    %c0_25 = arith.constant 0 : index
    %c0_26 = arith.constant 0 : index
    %55 = vector.load %arg8[%c0_25, %c0_26] : memref<1x16xf32, #tpu.memory_space<vmem>>, vector<1x16xf32>
    %56 = vector.shape_cast %55 : vector<1x16xf32> to vector<1x16xf32>
    %57 = vector.broadcast %56 : vector<1x16xf32> to vector<16x16xf32>
    %58 = arith.addf %57, %54 : vector<16x16xf32>
    %59 = vector.extract_strided_slice %52 {offsets = [0, 0], sizes = [16, 16], strides = [1, 1]} : vector<18x16xbf16> to vector<16x16xbf16>
    %c0_27 = arith.constant 0 : index
    %c0_28 = arith.constant 0 : index
    %60 = vector.load %arg7[%c0_27, %c0_28] : memref<48x16xbf16, #tpu.memory_space<vmem>>, vector<16x16xbf16>
    %cst_29 = arith.constant dense<0.000000e+00> : vector<16x16xf32>
    %61 = tpu.matmul %59, %60, %cst_29 {dimension_numbers = #tpu.dot_dimension_numbers<[1], [0], [0], [1], [0, 0, 1, 1], [], []>} : vector<16x16xbf16>, vector<16x16xbf16>, vector<16x16xf32> -> vector<16x16xf32>
    %62 = arith.addf %58, %61 : vector<16x16xf32>
    %63 = vector.extract_strided_slice %52 {offsets = [1, 0], sizes = [16, 16], strides = [1, 1]} : vector<18x16xbf16> to vector<16x16xbf16>
    %c16_30 = arith.constant 16 : index
    %c0_31 = arith.constant 0 : index
    %64 = vector.load %arg7[%c16_30, %c0_31] : memref<48x16xbf16, #tpu.memory_space<vmem>>, vector<16x16xbf16>
    %cst_32 = arith.constant dense<0.000000e+00> : vector<16x16xf32>
    %65 = tpu.matmul %63, %64, %cst_32 {dimension_numbers = #tpu.dot_dimension_numbers<[1], [0], [0], [1], [0, 0, 1, 1], [], []>} : vector<16x16xbf16>, vector<16x16xbf16>, vector<16x16xf32> -> vector<16x16xf32>
    %66 = arith.addf %62, %65 : vector<16x16xf32>
    %67 = vector.extract_strided_slice %52 {offsets = [2, 0], sizes = [16, 16], strides = [1, 1]} : vector<18x16xbf16> to vector<16x16xbf16>
    %c32_33 = arith.constant 32 : index
    %c0_34 = arith.constant 0 : index
    %68 = vector.load %arg7[%c32_33, %c0_34] : memref<48x16xbf16, #tpu.memory_space<vmem>>, vector<16x16xbf16>
    %cst_35 = arith.constant dense<0.000000e+00> : vector<16x16xf32>
    %69 = tpu.matmul %67, %68, %cst_35 {dimension_numbers = #tpu.dot_dimension_numbers<[1], [0], [0], [1], [0, 0, 1, 1], [], []>} : vector<16x16xbf16>, vector<16x16xbf16>, vector<16x16xf32> -> vector<16x16xf32>
    %70 = arith.addf %66, %69 : vector<16x16xf32>
    %c0_36 = arith.constant 0 : index
    %c0_37 = arith.constant 0 : index
    %c0_38 = arith.constant 0 : index
    %71 = vector.load %arg9[%c0_36, %c0_37, %c0_38] : memref<1x16x16xf32, #tpu.memory_space<vmem>>, vector<1x16x16xf32>
    %72 = vector.shape_cast %71 : vector<1x16x16xf32> to vector<16x16xf32>
    %73 = vector.shape_cast %70 : vector<16x16xf32> to vector<1x16x16xf32>
    tpu.vector_store %arg9[%c0_36, %c0_37, %c0_38], %73 {strides = array<i32>} : memref<1x16x16xf32, #tpu.memory_space<vmem>>, vector<1x16x16xf32>,
    return
  }
  func.func @transform_0(%arg0: i32, %arg1: i32) -> (i32, i32, i32) {
    %c2_i32 = arith.constant 2 : i32
    %0 = arith.muli %arg0, %c2_i32 : i32
    %c1_i32 = arith.constant 1 : i32
    %1 = arith.subi %0, %c1_i32 : i32
    %c0_i32 = arith.constant 0 : i32
    %2 = arith.maxsi %1, %c0_i32 : i32
    %c0_i32_0 = arith.constant 0 : i32
    %c0_i32_1 = arith.constant 0 : i32
    return %arg1, %2, %c0_i32_0 : i32, i32, i32
  }
  func.func @transform_1(%arg0: i32, %arg1: i32) -> (i32, i32, i32) {
    %c0_i32 = arith.constant 0 : i32
    %c0_i32_0 = arith.constant 0 : i32
    return %arg1, %arg0, %c0_i32 : i32, i32, i32
  }
  func.func @transform_2(%arg0: i32, %arg1: i32) -> (i32, i32, i32) {
    %c1_i32 = arith.constant 1 : i32
    %0 = arith.addi %arg0, %c1_i32 : i32
    %c2_i32 = arith.constant 2 : i32
    %1 = arith.muli %0, %c2_i32 : i32
    %c5_i32 = arith.constant 5 : i32
    %2 = arith.minsi %1, %c5_i32 : i32
    %c0_i32 = arith.constant 0 : i32
    %c0_i32_0 = arith.constant 0 : i32
    return %arg1, %2, %c0_i32 : i32, i32, i32
  }
  func.func @transform_3(%arg0: i32, %arg1: i32) -> (i32, i32) {
    %c0_i32 = arith.constant 0 : i32
    %c0_i32_0 = arith.constant 0 : i32
    %c0_i32_1 = arith.constant 0 : i32
    return %c0_i32, %c0_i32_0 : i32, i32
  }
  func.func @transform_4(%arg0: i32, %arg1: i32) -> (i32, i32) {
    %c0_i32 = arith.constant 0 : i32
    %c0_i32_0 = arith.constant 0 : i32
    %c0_i32_1 = arith.constant 0 : i32
    return %c0_i32, %c0_i32_0 : i32, i32
  }
  func.func @transform_5(%arg0: i32, %arg1: i32) -> (i32, i32) {
    %c0_i32 = arith.constant 0 : i32
    %c0_i32_0 = arith.constant 0 : i32
    %c0_i32_1 = arith.constant 0 : i32
    return %c0_i32, %c0_i32_0 : i32, i32
  }
  func.func @transform_6(%arg0: i32, %arg1: i32) -> (i32, i32) {
    %c0_i32 = arith.constant 0 : i32
    %c0_i32_0 = arith.constant 0 : i32
    %c0_i32_1 = arith.constant 0 : i32
    return %c0_i32, %c0_i32_0 : i32, i32
  }
  func.func @transform_7(%arg0: i32, %arg1: i32) -> (i32, i32, i32) {
    %c0_i32 = arith.constant 0 : i32
    %c0_i32_0 = arith.constant 0 : i32
    return %arg1, %arg0, %c0_i32 : i32, i32, i32
  }
}

</mosaic_0001>

<bundles_post_ra>
// kernel: resblock_forward.4
= control target key start
LH: loop header
LB: loop body
LE: loop exit
PB: predicated region body
PF: predicated region fallthrough
CT: control target
= control target key end

     0   :  { %s1343_s24 = smov 0   ;;  %s1345_s25 = smov 0   ;;  %s1468_s0 = inlined_call_operand.vmem [shape: f32[2,48,16], index: 0, kind: input, shape index: {}, may-alias: {0,1,2}]   ;;  %s1469_s1 = inlined_call_operand.vmem [shape: f32[2,48,16], index: 1, kind: input, shape index: {}, may-alias: {0,1,2}]   ;;  %s1470_s2 = inlined_call_operand.vmem [shape: f32[2,48,16], index: 2, kind: input, shape index: {}, may-alias: {0,1,2}]   ;;  %s1471_s3 = inlined_call_operand.vmem [shape: bf16[48,16], index: 3, kind: input, shape index: {}]   ;;  %s1472_s4 = inlined_call_operand.vmem [shape: f32[1,16], index: 4, kind: input, shape index: {}]   ;;  %s1473_s5 = inlined_call_operand.vmem [shape: bf16[48,16], index: 5, kind: input, shape index: {}]   ;;  %s1474_s6 = inlined_call_operand.vmem [shape: f32[1,16], index: 6, kind: input, shape index: {}]   ;;  %s1475_s7 = inlined_call_operand.vmem [shape: f32[2,48,16], index: 7, kind: output, shape index: {}]  }
   0x1   :  { %s1347_s26 = smov 0   ;;  %s1349_s27 = smov 0  }
   0x2   :  { %s1351_s28 = smov 0  }
   0x3 LB: > { %s26_s29 = sadd.s32 1, %s1290_s26  ;;  %s29_s30 = sadd.s32 1, %s1294_s27  ;;  %s1298_s28 = sphi %s1351_s28, %s17_s28   ;;  %s1294_s27 = sphi %s1349_s27, %s1480_s27   ;;  %s1290_s26 = sphi %s1347_s26, %s1479_s26   ;;  %s1286_s25 = sphi %s1345_s25, %s1478_s25   ;;  %s1282_s24 = sphi %s1343_s24, %s1477_s24  }
   0x4   : > { %p27_p0 = scmp.ge.s32.totalorder %s26_s29, 2  ;;  %p1089_p1 = scmp.ge.s32.totalorder %s1298_s28, 1 }
   0x5   : > { %p320_p2 = scmp.lt.s32.totalorder %s1298_s28, 7 }
   0x6   : > { %s1482_s29 = smov (%p27_p0, %s26_s29), 0  ;;  %s1484_s30 = smov (!%p27_p0, %s29_s30), %s1294_s27 }
   0x7   : > { %p321_p3 = pnand %p1089_p1, %p320_p2  ;;  %p31_p4 = scmp.ge.s32.totalorder %s1484_s30, 3 }
   0x8   : > { %v1254_v0 = vld [vmem:[%s1471_s3] sm:$0xff] (!%p321_p3)   ;;  %s1090_s10 = sshll.u32 (!%p321_p3), %s1286_s25, 1  ;;  %p388_p5 = scmp.lt.s32.totalorder (!%p321_p3), %s1282_s24, 1  ;;  %v1382_v1 = vld [vmem:[%s1471_s3 + $0x8] sm:$0xff] (!%p321_p3)   ;;  %v444_v2 = vlaneseq (!%p321_p3)  ;;  %v1300_v16 = vmov (!%p321_p3), 0   ;;  %v1256_v41 = vld [vmem:[%s1471_s3 + $0x10] sm:$0xff] (!%p321_p3)  }
   0x9   : > { %s1486_s30 = smov (%p31_p4, %s1484_s30), 0  ;;  %324 = sbr.rel (%p321_p3) target bundleno = 526 (0x20e), region = 48 }
   0xa   : > { %s1091_s11 = sadd.s32 (!%p321_p3), 4294967295, %s1090_s10  ;;  %1153 = vmatprep.subr.bf16.mxu0 (!%p321_p3), %v1254_v0  ;;  %p403_p8 = scmp.lt.s32.totalorder (!%p321_p3), %s1090_s10, 5  ;;  %v445_v3 = vshrl.u32 (!%p321_p3), %v444_v2, 7  ;;  %v1257_v49 = vld [vmem:[%s1473_s5] sm:$0xff] (!%p321_p3)   ;;  %v1301_v50 = vmov (!%p321_p3), 0.0  }
   0xb   : > { %p386_p6 = scmp.gt.s32.totalorder (!%p321_p3), %s1091_s11, 0  ;;  %p1092_p7 = scmp.lt.s32.totalorder (!%p321_p3), %s1091_s11, 5  ;;  %1154 = vmatpush3.bf16.msra.mxu0 (!%p321_p3), %v1254_v0  ;;  %1171 = vmatprep.subr.bf16.mxu1 (!%p321_p3), %v1301_v50  ;;  %v1111_v59 = vld [vmem:[%s1472_s4] ss:$0 sm:$0xff] (!%p321_p3) }
   0xc   : > { %1159 = vmatprep.subr.bf16.mxu0 (!%p321_p3), %v1382_v1  ;;  %s1137_s15 = sadd.s32 (!%p321_p3), 2, %s1090_s10  ;;  %v446_v4 = vadd.s32 (!%p321_p3), 8, %v445_v3  ;;  %v447_v5 = vadd.s32 (!%p321_p3), 16, %v445_v3  ;;  %v448_v6 = vadd.s32 (!%p321_p3), 24, %v445_v3  ;;  %s1107_s18 = sshll.u32 (!%p321_p3), %s1286_s25, 4  ;;  %1172 = vmatpush3.bf16.msra.mxu1 (!%p321_p3), %v1257_v49 }
   0xd   : > { %p1385_p9 = scmp.lt.s32.totalorder (!%p321_p3), %s1137_s15, 5  ;;  %s1108_s20 = sadd.s32 (!%p321_p3), 4294967288, %s1107_s18  ;;  %1177 = vmatprep.subr.bf16.mxu1 (!%p321_p3), %v1301_v50 }
   0xe   : > { %v451_v7 = vstv (!%p321_p3), %s1108_s20 }
   0xf   : > { %v452_v8 = vadd.s32 (!%p321_p3), %v451_v7, %v445_v3  ;;  %v453_v9 = vadd.s32 (!%p321_p3), %v451_v7, %v446_v4  ;;  %v454_v10 = vadd.s32 (!%p321_p3), %v451_v7, %v447_v5  ;;  %v455_v11 = vadd.s32 (!%p321_p3), %v451_v7, %v448_v6 }
  0x10   : > { %s1488_s24 = smov (!%p388_p5, %s1282_s24), 1  ;;  %s1490_s11 = smov (!%p386_p6, %s1091_s11), 0 }
  0x11   : > { %s1492_s11 = smov (!%p1092_p7, %s1490_s11), 5  ;;  %s1210_s14 = smul.u32 6, %s1488_s24  ;;  %vm456_vm0 = vcmp.ge.s32.totalorder %v452_v8, 0  ;;  %vm457_vm1 = vcmp.ge.s32.totalorder %v453_v9, 0  ;;  %vm458_vm2 = vcmp.ge.s32.totalorder %v454_v10, 0  ;;  %vm460_vm3 = vcmp.lt.s32.totalorder %v452_v8, 48 }
  0x12   : > { %s1494_s10 = smov (!%p403_p8, %s1090_s10), 5  ;;  %s1496_s15 = smov (!%p1385_p9, %s1137_s15), 5  ;;  %vm461_vm4 = vcmp.lt.s32.totalorder %v453_v9, 48  ;;  %vm462_vm5 = vcmp.lt.s32.totalorder %v454_v10, 48  ;;  %vm459_vm6 = vcmp.ge.s32.totalorder %v455_v11, 0  ;;  %vm463_vm7 = vcmp.lt.s32.totalorder %v455_v11, 48  ;;  %vm464_vm8 = vmand %vm456_vm0, %vm460_vm3 }
  0x13   : > { %s393_s17 = sadd.s32 %s1210_s14, %s1492_s11  ;;  %s406_s19 = sadd.s32 %s1210_s14, %s1494_s10  ;;  %vm465_vm9 = vmand %vm457_vm1, %vm461_vm4  ;;  %vm513_vm4 = vcmask 1045504  }
  0x14   : > { %s1498_s15 = smov (!%p1385_p9, %s1496_s15), 5  ;;  %s1097_s21 = sshll.u32 %s393_s17, 3  ;;  %vm466_vm10 = vmand %vm458_vm2, %vm462_vm5  ;;  %vm523_vm5 = vcmask 130048  }
  0x15   : > { %s1394_s22 = sshll.u32 %s406_s19, 3  ;;  %s419_s23 = sadd.s32 %s1210_s14, %s1498_s15  ;;  %vm467_vm11 = vmand %vm459_vm6, %vm463_vm7  ;;  %vm583_vm6 = vsmask.f32 4352  ;;  %vm666_vm7 = vcmask 1042432  }
  0x16   : > { %s1104_s24 = sshll.u32 %s419_s23, 3  ;;  %s395_s9 = scalar_lea.vmem %s1468_s0, %s1097_s21  ;;  %vm478_vm12 = vmpackc.low %vm464_vm8, %vm464_vm8  ;;  %vm1302_vm8 = vmmov 0  }
  0x17   : > { %s408_s12 = scalar_lea.vmem %s1469_s1, %s1394_s22  ;;  %s421_s15 = scalar_lea.vmem %s1470_s2, %s1104_s24  ;;  %v440_v12 = vld [vmem:[%s395_s9] sm:$0xff]  ;;  %vm479_vm13 = vmpackc.low %vm465_vm9, %vm465_vm9  ;;  %v482_v17 = vsel %vm478_vm12, 65537, %v1300_v16  ;;  %1173 = vmatprep.mubr.msk.bf16.mxu1 %vm1302_vm8, %v1301_v50 }
  0x18   : > { %v1406_v13 = vld [vmem:[%s408_s12] sm:$0xff]  ;;  %v1408_v14 = vld [vmem:[%s408_s12 + $0x8] sm:$0xff]  ;;  %vm480_vm14 = vmpackc.low %vm466_vm10, %vm466_vm10  ;;  %v483_v19 = vsel %vm479_vm13, 65537, %v1300_v16  ;;  %vm895_vm13 = vcmask 1046528   ;;  %s434_s13 = scalar_lea.vmem %s1475_s7, %s1394_s22 }
  0x19   : > { %v443_v15 = vld [vmem:[%s421_s15] sm:$0xff]  ;;  %v468_v18 = vpack.c.bf16 %v1406_v13, %v440_v12  ;;  %vm481_vm15 = vmpackc.low %vm467_vm11, %vm467_vm11  ;;  %v484_v20 = vsel %vm480_vm14, 65537, %v1300_v16  ;;  %v1109_v21 = vcombine.low %v482_v17, %v483_v19  ;;  %vm827_vm14 = vsmask.f32 7424 }
  0x1a   : > { %v469_v22 = vpack.c.bf16 %v443_v15, %v1408_v14  ;;  %v485_v23 = vsel %vm481_vm15, 65537, %v1300_v16  ;;  %v1258_v15 = vld [vmem:[%s1473_s5 + $0x8] sm:$0xff]  }
  0x1b   : > { %v1110_v24 = vcombine.low %v484_v20, %v485_v23  ;;  %vm492_vm0 = vcmp.ne.s16.totalorder %v1109_v21, 0  ;;  %v736_v53 = vshrl.u32 %v1109_v21, 16  ;;  %v739_v54 = vshll.u32 %v1109_v21, 16 }
  0x1c   : > { %v494_v25 = vsel %vm492_vm0, %v468_v18, 0 }
  0x1d   : > { %vm493_vm1 = vcmp.ne.s16.totalorder %v1110_v24, 0  ;;  %vm496_vm2 = vcmp.ge.bf16.partialorder %v494_v25, 0  ;;  %v498_v26 = vmul.bf16 1036860877, %v494_v25  ;;  %v744_v51 = vshrl.u32 %v1110_v24, 16 }
  0x1e   : > { %v495_v27 = vsel %vm493_vm1, %v469_v22, 0  ;;  %v747_v52 = vshll.u32 %v1110_v24, 16  ;;  %v738_v57 = vrot.slane %v736_v53, 3  ;;  %v741_v58 = vrot.slane %v739_v54, 4 }
  0x1f   : > { %vm497_vm3 = vcmp.ge.bf16.partialorder %v495_v27, 0  ;;  %v499_v28 = vmul.bf16 1036860877, %v495_v27  ;;  %v500_v29 = vsel %vm496_vm2, %v494_v25, %v498_v26  ;;  %v746_v55 = vrot.slane %v744_v51, 3 }
  0x20   : > { %v514_v30 = vrot.slane %v500_v29, 2  ;;  %v585_v31 = vshrl.u32 %v500_v29, 16  ;;  %v588_v32 = vshll.u32 %v500_v29, 16  ;;  %v667_v46 = vrot.slane %v500_v29, 5 }
  0x21   : > { %v501_v33 = vsel %vm497_vm3, %v495_v27, %v499_v28  ;;  %v749_v56 = vrot.slane %v747_v52, 4  ;;  %v742_v61 = vor.u32 %v741_v58, %v738_v57  ;;  %v1259_v27 = vld [vmem:[%s1473_s5 + $0x10] sm:$0xff]   ;;  %v1121_v28 = vld [vmem:[%s1474_s6] ss:$0 sm:$0xff] }
  0x22   : > { %v515_v34 = vrot.slane %v501_v33, 2  ;;  %v587_v35 = vrot.slane %v585_v31, 3  ;;  %v590_v36 = vrot.slane %v588_v32, 4  ;;  %v593_v37 = vshrl.u32 %v501_v33, 16 }
  0x23   : > { %v596_v38 = vshll.u32 %v501_v33, 16  ;;  %v668_v47 = vrot.slane %v501_v33, 5  ;;  %v750_v60 = vor.u32 %v749_v56, %v746_v55  ;;  %v769_v29 = vadd.f32 %v1121_v28, %v1406_v13 }
  0x24   : > { %v516_v39 = vsel %vm513_vm4, %v514_v30, %v515_v34  ;;  %v595_v40 = vrot.slane %v593_v37, 3  ;;  %v591_v42 = vor.u32 %v590_v36, %v587_v35  ;;  %v770_v30 = vadd.f32 %v1121_v28, %v1408_v14 }
  0x25   : > { %1155 = vmatprep.mubr.msk.bf16.mxu0 %vm523_vm5, %v516_v39  ;;  %v598_v43 = vrot.slane %v596_v38, 4  ;;  %v669_v48 = vsel %vm666_vm7, %v667_v46, %v668_v47  ;;  %vm753_vm9 = vcmp.ne.s16.totalorder %v750_v60, 0  ;;  %v751_v2 = vsel %vm583_vm6, %v742_v61, %v750_v60 }
  0x26   : > { %1156 = vmatmul.mubr.msk.bf16.vlgmr.msra.gmra.mrb[0].mxu0 %vm523_vm5, %v515_v34  ;;  %vm752_vm10 = vcmp.ne.s16.totalorder %v751_v2, 0 }
  0x27   : > { %1160 = vmatpush3.bf16.msra.mxu0 %v1382_v1  ;;  %v599_v44 = vor.u32 %v598_v43, %v595_v40 }
  0x28   : > { %1165 = vmatprep.subr.bf16.mxu0 %v1256_v41 }
  0x29   : > { %v600_v45 = vsel %vm583_vm6, %v591_v42, %v599_v44 }
  0x2a   : > { %1161 = vmatprep.mubr.msk.bf16.mxu0 %vm523_vm5, %v600_v45 }
  0x32   : > { %1162 = vmatmul.mubr.msk.bf16.vlgmr.msra.gmra.mrb[0].mxu0 %vm523_vm5, %v599_v44 }
  0x33   : > { %1166 = vmatpush3.bf16.msra.mxu0 %v1256_v41  ;;  %1167 = vmatprep.mubr.msk.bf16.mxu0 %vm523_vm5, %v669_v48 }
  0x3e   : > { %1168 = vmatmul.mubr.msk.bf16.vlgmr.msra.gmra.mrb[0].mxu0 %vm523_vm5, %v668_v47 }
 0x111   : > { %v1169_v62 = vpop.f32.mrb[0].mxu0 }
 0x112   : > { %v1189_v63 = vadd.f32 %v1169_v62, %v1111_v59  ;;  %v716_v0 = vpop.f32.mrb[1].mxu0 }
 0x113   : > { %v1170_v1 = vpop.f32.mrb[2].mxu0  ;;  %v1190_v5 = vadd.f32 %v1111_v59, %v716_v0 }
 0x114   : > { %v734_v3 = vpack.c.bf16 %v1189_v63, %v1189_v63  ;;  %v719_v4 = vpop.f32.mrb[3].mxu0 }
 0x115   : > { %v1191_v6 = vadd.f32 %v1111_v59, %v719_v4 }
 0x116   : > { %v755_v7 = vsel %vm753_vm9, %v734_v3, 0 }
 0x117   : > { %vm757_vm11 = vcmp.ge.bf16.partialorder %v755_v7, 0  ;;  %v759_v8 = vmul.bf16 1036860877, %v755_v7  ;;  %v733_v9 = vpack.c.bf16 %v1191_v6, %v1190_v5 }
 0x119   : > { %v754_v10 = vsel %vm752_vm10, %v733_v9, 0  ;;  %v761_v11 = vsel %vm757_vm11, %v755_v7, %v759_v8 }
 0x11a   : > { %v758_v12 = vmul.bf16 1036860877, %v754_v10  ;;  %vm756_vm12 = vcmp.ge.bf16.partialorder %v754_v10, 0  ;;  %v835_v17 = vshll.u32 %v761_v11, 16  ;;  %v897_v18 = vrot.slane %v761_v11, 1 }
 0x11c   : > { %v760_v16 = vsel %vm756_vm12, %v754_v10, %v758_v12  ;;  %v837_v24 = vrot.slane %v835_v17, 1 }
 0x11d   : > { %1174 = vmatmul.mubr.msk.bf16.vlgmr.msra.gmra.mrb[0].mxu1 %vm523_vm5, %v760_v16  ;;  %v830_v19 = vshll.u32 %v760_v16, 16  ;;  %v896_v20 = vrot.slane %v760_v16, 1  ;;  %v828_v21 = vshrl.u32 %v760_v16, 16 }
 0x11e   : > { %1178 = vmatpush3.bf16.msra.mxu1 %v1258_v15  ;;  %1179 = vmatprep.mubr.msk.bf16.mxu1 %vm1302_vm8, %v1301_v50 }
 0x11f   : > { %v832_v22 = vrot.slane %v830_v19, 1  ;;  %1183 = vmatprep.subr.bf16.mxu1 %v1301_v50  ;;  %v898_v23 = vsel %vm895_vm13, %v896_v20, %v897_v18 }
 0x121   : > { %v833_v25 = vor.u32 %v832_v22, %v828_v21 }
 0x123   : > { %v838_v26 = vsel %vm827_vm14, %v833_v25, %v837_v24 }
 0x129   : > { %1180 = vmatmul.mubr.msk.bf16.vlgmr.msra.gmra.mrb[0].mxu1 %vm523_vm5, %v838_v26 }
 0x12a   : > { %1184 = vmatpush3.bf16.msra.mxu1 %v1259_v27  ;;  %1185 = vmatprep.mubr.msk.bf16.mxu1 %vm1302_vm8, %v1301_v50 }
 0x135   : > { %1186 = vmatmul.mubr.msk.bf16.vlgmr.msra.gmra.mrb[0].mxu1 %vm523_vm5, %v898_v23 }
 0x208   : > { %v942_v31 = vpop.f32.mrb[0].mxu1 }
 0x209   : > { %v1192_v32 = vadd.f32 %v942_v31, %v769_v29  ;;  %v1187_v33 = vpop.f32.mrb[1].mxu1 }
 0x20a   : > { %v945_v34 = vpop.f32.mrb[2].mxu1 }
 0x20b   : > { %951 = vst.msk [vmem:[%s434_s13] sm:$0xff] %vm523_vm5, %v1192_v32  ;;  %v1193_v35 = vadd.f32 %v945_v34, %v770_v30  ;;  %v1188_v36 = vpop.f32.mrb[3].mxu1 }
 0x20d   : > { %952 = vst.msk [vmem:[%s434_s13 + $0x8] sm:$0xff] %vm523_vm5, %v1193_v35 }
 0x20e PF: > { %s17_s28 = sadd.s32 1, %s1298_s28   ;;  %s1477_s24 = smov %s1290_s26 }
 0x20f   : > { %p14_p10 = scmp.ge.s32.totalorder %s17_s28, 8   ;;  %s1478_s25 = smov %s1294_s27 }
 0x210   : > { %s1479_s26 = smov %s1482_s29  ;;  %s1480_s27 = smov %s1486_s30 }
 0x211   :  { %16 = sbr.rel (!%p14_p10) target bundleno = 3 (0x3), region = 84 }

// kernel: resblock_forward.5
= control target key start
LH: loop header
LB: loop body
LE: loop exit
PB: predicated region body
PF: predicated region fallthrough
CT: control target
= control target key end

     0   :  { %s1342_s24 = smov 0   ;;  %s1344_s25 = smov 0   ;;  %s1469_s0 = inlined_call_operand.vmem [shape: f32[2,48,16], index: 0, kind: input, shape index: {}, may-alias: {0,1,2}]   ;;  %s1470_s1 = inlined_call_operand.vmem [shape: f32[2,48,16], index: 1, kind: input, shape index: {}, may-alias: {0,1,2}]   ;;  %s1471_s2 = inlined_call_operand.vmem [shape: f32[2,48,16], index: 2, kind: input, shape index: {}, may-alias: {0,1,2}]   ;;  %s1472_s3 = inlined_call_operand.vmem [shape: bf16[48,16], index: 3, kind: input, shape index: {}]   ;;  %s1473_s4 = inlined_call_operand.vmem [shape: f32[1,16], index: 4, kind: input, shape index: {}]   ;;  %s1474_s5 = inlined_call_operand.vmem [shape: bf16[48,16], index: 5, kind: input, shape index: {}]   ;;  %s1475_s6 = inlined_call_operand.vmem [shape: f32[1,16], index: 6, kind: input, shape index: {}]   ;;  %s1476_s7 = inlined_call_operand.vmem [shape: f32[2,48,16], index: 7, kind: output, shape index: {}]  }
   0x1   :  { %s1346_s26 = smov 0   ;;  %s1348_s27 = smov 0  }
   0x2   :  { %s1350_s28 = smov 0  }
   0x3 LB: > { %s26_s29 = sadd.s32 1, %s1289_s26  ;;  %s29_s30 = sadd.s32 1, %s1293_s27  ;;  %s1297_s28 = sphi %s1350_s28, %s17_s28   ;;  %s1293_s27 = sphi %s1348_s27, %s1481_s27   ;;  %s1289_s26 = sphi %s1346_s26, %s1480_s26   ;;  %s1285_s25 = sphi %s1344_s25, %s1479_s25   ;;  %s1281_s24 = sphi %s1342_s24, %s1478_s24  }
   0x4   : > { %p27_p0 = scmp.ge.s32.totalorder %s26_s29, 2  ;;  %p1088_p1 = scmp.ge.s32.totalorder %s1297_s28, 1 }
   0x5   : > { %p320_p2 = scmp.lt.s32.totalorder %s1297_s28, 7 }
   0x6   : > { %s1483_s29 = smov (%p27_p0, %s26_s29), 0  ;;  %s1485_s30 = smov (!%p27_p0, %s29_s30), %s1293_s27 }
   0x7   : > { %p321_p3 = pnand %p1088_p1, %p320_p2  ;;  %p31_p4 = scmp.ge.s32.totalorder %s1485_s30, 3 }
   0x8   : > { %v1253_v0 = vld [vmem:[%s1472_s3] sm:$0xff] (!%p321_p3)   ;;  %s1089_s10 = sshll.u32 (!%p321_p3), %s1285_s25, 1  ;;  %p388_p5 = scmp.lt.s32.totalorder (!%p321_p3), %s1281_s24, 1  ;;  %v1381_v1 = vld [vmem:[%s1472_s3 + $0x8] sm:$0xff] (!%p321_p3)   ;;  %v444_v2 = vlaneseq (!%p321_p3)  ;;  %v1299_v16 = vmov (!%p321_p3), 0   ;;  %v1255_v41 = vld [vmem:[%s1472_s3 + $0x10] sm:$0xff] (!%p321_p3)  }
   0x9   : > { %s1487_s30 = smov (%p31_p4, %s1485_s30), 0  ;;  %324 = sbr.rel (%p321_p3) target bundleno = 526 (0x20e), region = 48 }
   0xa   : > { %s1090_s11 = sadd.s32 (!%p321_p3), 4294967295, %s1089_s10  ;;  %1152 = vmatprep.subr.bf16.mxu0 (!%p321_p3), %v1253_v0  ;;  %p403_p8 = scmp.lt.s32.totalorder (!%p321_p3), %s1089_s10, 5  ;;  %v445_v3 = vshrl.u32 (!%p321_p3), %v444_v2, 7  ;;  %v1256_v49 = vld [vmem:[%s1474_s5] sm:$0xff] (!%p321_p3)   ;;  %v1300_v50 = vmov (!%p321_p3), 0.0  }
   0xb   : > { %p386_p6 = scmp.gt.s32.totalorder (!%p321_p3), %s1090_s11, 0  ;;  %p1091_p7 = scmp.lt.s32.totalorder (!%p321_p3), %s1090_s11, 5  ;;  %1153 = vmatpush3.bf16.msra.mxu0 (!%p321_p3), %v1253_v0  ;;  %1170 = vmatprep.subr.bf16.mxu1 (!%p321_p3), %v1300_v50  ;;  %v1110_v59 = vld [vmem:[%s1473_s4] ss:$0 sm:$0xff] (!%p321_p3) }
   0xc   : > { %1158 = vmatprep.subr.bf16.mxu0 (!%p321_p3), %v1381_v1  ;;  %s1136_s15 = sadd.s32 (!%p321_p3), 2, %s1089_s10  ;;  %v446_v4 = vadd.s32 (!%p321_p3), 8, %v445_v3  ;;  %v447_v5 = vadd.s32 (!%p321_p3), 16, %v445_v3  ;;  %v448_v6 = vadd.s32 (!%p321_p3), 24, %v445_v3  ;;  %s1106_s18 = sshll.u32 (!%p321_p3), %s1285_s25, 4  ;;  %1171 = vmatpush3.bf16.msra.mxu1 (!%p321_p3), %v1256_v49 }
   0xd   : > { %p1384_p9 = scmp.lt.s32.totalorder (!%p321_p3), %s1136_s15, 5  ;;  %s1107_s20 = sadd.s32 (!%p321_p3), 4294967288, %s1106_s18  ;;  %1176 = vmatprep.subr.bf16.mxu1 (!%p321_p3), %v1300_v50 }
   0xe   : > { %v451_v7 = vstv (!%p321_p3), %s1107_s20 }
   0xf   : > { %v452_v8 = vadd.s32 (!%p321_p3), %v451_v7, %v445_v3  ;;  %v453_v9 = vadd.s32 (!%p321_p3), %v451_v7, %v446_v4  ;;  %v454_v10 = vadd.s32 (!%p321_p3), %v451_v7, %v447_v5  ;;  %v455_v11 = vadd.s32 (!%p321_p3), %v451_v7, %v448_v6 }
  0x10   : > { %s1489_s24 = smov (!%p388_p5, %s1281_s24), 1  ;;  %s1491_s11 = smov (!%p386_p6, %s1090_s11), 0 }
  0x11   : > { %s1493_s11 = smov (!%p1091_p7, %s1491_s11), 5  ;;  %s1209_s14 = smul.u32 6, %s1489_s24  ;;  %vm456_vm0 = vcmp.ge.s32.totalorder %v452_v8, 0  ;;  %vm457_vm1 = vcmp.ge.s32.totalorder %v453_v9, 0  ;;  %vm458_vm2 = vcmp.ge.s32.totalorder %v454_v10, 0  ;;  %vm460_vm3 = vcmp.lt.s32.totalorder %v452_v8, 48 }
  0x12   : > { %s1495_s10 = smov (!%p403_p8, %s1089_s10), 5  ;;  %s1497_s15 = smov (!%p1384_p9, %s1136_s15), 5  ;;  %vm461_vm4 = vcmp.lt.s32.totalorder %v453_v9, 48  ;;  %vm462_vm5 = vcmp.lt.s32.totalorder %v454_v10, 48  ;;  %vm459_vm6 = vcmp.ge.s32.totalorder %v455_v11, 0  ;;  %vm463_vm7 = vcmp.lt.s32.totalorder %v455_v11, 48  ;;  %vm464_vm8 = vmand %vm456_vm0, %vm460_vm3 }
  0x13   : > { %s393_s17 = sadd.s32 %s1209_s14, %s1493_s11  ;;  %s406_s19 = sadd.s32 %s1209_s14, %s1495_s10  ;;  %vm465_vm9 = vmand %vm457_vm1, %vm461_vm4  ;;  %vm513_vm4 = vcmask 1046528  }
  0x14   : > { %s1499_s15 = smov (!%p1384_p9, %s1497_s15), 5  ;;  %s1096_s21 = sshll.u32 %s393_s17, 3  ;;  %vm466_vm10 = vmand %vm458_vm2, %vm462_vm5  ;;  %vm523_vm5 = vcmask 130048  }
  0x15   : > { %s1393_s22 = sshll.u32 %s406_s19, 3  ;;  %s419_s23 = sadd.s32 %s1209_s14, %s1499_s15  ;;  %vm467_vm11 = vmand %vm459_vm6, %vm463_vm7  ;;  %vm583_vm6 = vsmask.f32 4352  ;;  %vm666_vm7 = vcmask 1041408  }
  0x16   : > { %s1103_s24 = sshll.u32 %s419_s23, 3  ;;  %s395_s9 = scalar_lea.vmem %s1469_s0, %s1096_s21  ;;  %vm478_vm12 = vmpackc.low %vm464_vm8, %vm464_vm8  ;;  %vm1301_vm8 = vmmov 0  }
  0x17   : > { %s408_s12 = scalar_lea.vmem %s1470_s1, %s1393_s22  ;;  %s421_s15 = scalar_lea.vmem %s1471_s2, %s1103_s24  ;;  %v440_v12 = vld [vmem:[%s395_s9] sm:$0xff]  ;;  %vm479_vm13 = vmpackc.low %vm465_vm9, %vm465_vm9  ;;  %v482_v17 = vsel %vm478_vm12, 65537, %v1299_v16  ;;  %1172 = vmatprep.mubr.msk.bf16.mxu1 %vm1301_vm8, %v1300_v50 }
  0x18   : > { %v1405_v13 = vld [vmem:[%s408_s12] sm:$0xff]  ;;  %v1407_v14 = vld [vmem:[%s408_s12 + $0x8] sm:$0xff]  ;;  %vm480_vm14 = vmpackc.low %vm466_vm10, %vm466_vm10  ;;  %v483_v19 = vsel %vm479_vm13, 65537, %v1299_v16  ;;  %vm827_vm13 = vsmask.f32 7424  ;;  %s434_s13 = scalar_lea.vmem %s1476_s7, %s1393_s22 }
  0x19   : > { %v443_v15 = vld [vmem:[%s421_s15] sm:$0xff]  ;;  %v468_v18 = vpack.c.bf16 %v1405_v13, %v440_v12  ;;  %vm481_vm15 = vmpackc.low %vm467_vm11, %vm467_vm11  ;;  %v484_v20 = vsel %vm480_vm14, 65537, %v1299_v16  ;;  %v1108_v21 = vcombine.low %v482_v17, %v483_v19 }
  0x1a   : > { %v469_v22 = vpack.c.bf16 %v443_v15, %v1407_v14  ;;  %v485_v23 = vsel %vm481_vm15, 65537, %v1299_v16  ;;  %v1257_v15 = vld [vmem:[%s1474_s5 + $0x8] sm:$0xff]  }
  0x1b   : > { %v1109_v24 = vcombine.low %v484_v20, %v485_v23  ;;  %vm492_vm0 = vcmp.ne.s16.totalorder %v1108_v21, 0  ;;  %v736_v53 = vshrl.u32 %v1108_v21, 16  ;;  %v739_v54 = vshll.u32 %v1108_v21, 16 }
  0x1c   : > { %v494_v25 = vsel %vm492_vm0, %v468_v18, 0 }
  0x1d   : > { %vm493_vm1 = vcmp.ne.s16.totalorder %v1109_v24, 0  ;;  %vm496_vm2 = vcmp.ge.bf16.partialorder %v494_v25, 0  ;;  %v498_v26 = vmul.bf16 1036860877, %v494_v25  ;;  %v744_v51 = vshrl.u32 %v1109_v24, 16 }
  0x1e   : > { %v495_v27 = vsel %vm493_vm1, %v469_v22, 0  ;;  %v747_v52 = vshll.u32 %v1109_v24, 16  ;;  %v738_v57 = vrot.slane %v736_v53, 3  ;;  %v741_v58 = vrot.slane %v739_v54, 4 }
  0x1f   : > { %vm497_vm3 = vcmp.ge.bf16.partialorder %v495_v27, 0  ;;  %v499_v28 = vmul.bf16 1036860877, %v495_v27  ;;  %v500_v29 = vsel %vm496_vm2, %v494_v25, %v498_v26  ;;  %v746_v55 = vrot.slane %v744_v51, 3 }
  0x20   : > { %v514_v30 = vrot.slane %v500_v29, 1  ;;  %v585_v31 = vshrl.u32 %v500_v29, 16  ;;  %v588_v32 = vshll.u32 %v500_v29, 16  ;;  %v667_v46 = vrot.slane %v500_v29, 6 }
  0x21   : > { %v501_v33 = vsel %vm497_vm3, %v495_v27, %v499_v28  ;;  %v749_v56 = vrot.slane %v747_v52, 4  ;;  %v742_v61 = vor.u32 %v741_v58, %v738_v57  ;;  %v1258_v27 = vld [vmem:[%s1474_s5 + $0x10] sm:$0xff]   ;;  %v1120_v28 = vld [vmem:[%s1475_s6] ss:$0 sm:$0xff] }
  0x22   : > { %v515_v34 = vrot.slane %v501_v33, 1  ;;  %v587_v35 = vrot.slane %v585_v31, 3  ;;  %v590_v36 = vrot.slane %v588_v32, 4  ;;  %v593_v37 = vshrl.u32 %v501_v33, 16 }
  0x23   : > { %v596_v38 = vshll.u32 %v501_v33, 16  ;;  %v668_v47 = vrot.slane %v501_v33, 6  ;;  %v750_v60 = vor.u32 %v749_v56, %v746_v55  ;;  %v769_v29 = vadd.f32 %v1120_v28, %v1405_v13 }
  0x24   : > { %v516_v39 = vsel %vm513_vm4, %v514_v30, %v515_v34  ;;  %v595_v40 = vrot.slane %v593_v37, 3  ;;  %v591_v42 = vor.u32 %v590_v36, %v587_v35  ;;  %v770_v30 = vadd.f32 %v1120_v28, %v1407_v14 }
  0x25   : > { %1154 = vmatprep.mubr.msk.bf16.mxu0 %vm523_vm5, %v516_v39  ;;  %v598_v43 = vrot.slane %v596_v38, 4  ;;  %v669_v48 = vsel %vm666_vm7, %v667_v46, %v668_v47  ;;  %vm753_vm9 = vcmp.ne.s16.totalorder %v750_v60, 0  ;;  %v751_v2 = vsel %vm583_vm6, %v742_v61, %v750_v60 }
  0x26   : > { %1155 = vmatmul.mubr.msk.bf16.vlgmr.msra.gmra.mrb[0].mxu0 %vm523_vm5, %v515_v34  ;;  %vm752_vm10 = vcmp.ne.s16.totalorder %v751_v2, 0 }
  0x27   : > { %1159 = vmatpush3.bf16.msra.mxu0 %v1381_v1  ;;  %v599_v44 = vor.u32 %v598_v43, %v595_v40 }
  0x28   : > { %1164 = vmatprep.subr.bf16.mxu0 %v1255_v41 }
  0x29   : > { %v600_v45 = vsel %vm583_vm6, %v591_v42, %v599_v44 }
  0x2a   : > { %1160 = vmatprep.mubr.msk.bf16.mxu0 %vm523_vm5, %v600_v45 }
  0x32   : > { %1161 = vmatmul.mubr.msk.bf16.vlgmr.msra.gmra.mrb[0].mxu0 %vm523_vm5, %v599_v44 }
  0x33   : > { %1165 = vmatpush3.bf16.msra.mxu0 %v1255_v41  ;;  %1166 = vmatprep.mubr.msk.bf16.mxu0 %vm523_vm5, %v669_v48 }
  0x3e   : > { %1167 = vmatmul.mubr.msk.bf16.vlgmr.msra.gmra.mrb[0].mxu0 %vm523_vm5, %v668_v47 }
 0x111   : > { %v1168_v62 = vpop.f32.mrb[0].mxu0 }
 0x112   : > { %v1188_v63 = vadd.f32 %v1168_v62, %v1110_v59  ;;  %v716_v0 = vpop.f32.mrb[1].mxu0 }
 0x113   : > { %v1169_v1 = vpop.f32.mrb[2].mxu0  ;;  %v1189_v5 = vadd.f32 %v1110_v59, %v716_v0 }
 0x114   : > { %v734_v3 = vpack.c.bf16 %v1188_v63, %v1188_v63  ;;  %v719_v4 = vpop.f32.mrb[3].mxu0 }
 0x115   : > { %v1190_v6 = vadd.f32 %v1110_v59, %v719_v4 }
 0x116   : > { %v755_v7 = vsel %vm753_vm9, %v734_v3, 0 }
 0x117   : > { %vm757_vm11 = vcmp.ge.bf16.partialorder %v755_v7, 0  ;;  %v759_v8 = vmul.bf16 1036860877, %v755_v7  ;;  %v733_v9 = vpack.c.bf16 %v1190_v6, %v1189_v5 }
 0x119   : > { %v754_v10 = vsel %vm752_vm10, %v733_v9, 0  ;;  %v761_v11 = vsel %vm757_vm11, %v755_v7, %v759_v8 }
 0x11a   : > { %v758_v12 = vmul.bf16 1036860877, %v754_v10  ;;  %vm756_vm12 = vcmp.ge.bf16.partialorder %v754_v10, 0  ;;  %v835_v17 = vshll.u32 %v761_v11, 16  ;;  %v896_v18 = vrot.slane %v761_v11, 1 }
 0x11c   : > { %v760_v16 = vsel %vm756_vm12, %v754_v10, %v758_v12  ;;  %v837_v24 = vrot.slane %v835_v17, 1 }
 0x11d   : > { %1173 = vmatmul.mubr.msk.bf16.vlgmr.msra.gmra.mrb[0].mxu1 %vm523_vm5, %v760_v16  ;;  %v830_v19 = vshll.u32 %v760_v16, 16  ;;  %v895_v20 = vrot.slane %v760_v16, 1  ;;  %v828_v21 = vshrl.u32 %v760_v16, 16 }
 0x11e   : > { %1177 = vmatpush3.bf16.msra.mxu1 %v1257_v15  ;;  %1178 = vmatprep.mubr.msk.bf16.mxu1 %vm1301_vm8, %v1300_v50 }
 0x11f   : > { %v832_v22 = vrot.slane %v830_v19, 1  ;;  %1182 = vmatprep.subr.bf16.mxu1 %v1300_v50  ;;  %v897_v23 = vsel %vm513_vm4, %v895_v20, %v896_v18 }
 0x121   : > { %v833_v25 = vor.u32 %v832_v22, %v828_v21 }
 0x123   : > { %v838_v26 = vsel %vm827_vm13, %v833_v25, %v837_v24 }
 0x129   : > { %1179 = vmatmul.mubr.msk.bf16.vlgmr.msra.gmra.mrb[0].mxu1 %vm523_vm5, %v838_v26 }
 0x12a   : > { %1183 = vmatpush3.bf16.msra.mxu1 %v1258_v27  ;;  %1184 = vmatprep.mubr.msk.bf16.mxu1 %vm1301_vm8, %v1300_v50 }
 0x135   : > { %1185 = vmatmul.mubr.msk.bf16.vlgmr.msra.gmra.mrb[0].mxu1 %vm523_vm5, %v897_v23 }
 0x208   : > { %v941_v31 = vpop.f32.mrb[0].mxu1 }
 0x209   : > { %v1191_v32 = vadd.f32 %v941_v31, %v769_v29  ;;  %v1186_v33 = vpop.f32.mrb[1].mxu1 }
 0x20a   : > { %v944_v34 = vpop.f32.mrb[2].mxu1 }
 0x20b   : > { %950 = vst.msk [vmem:[%s434_s13] sm:$0xff] %vm523_vm5, %v1191_v32  ;;  %v1192_v35 = vadd.f32 %v944_v34, %v770_v30  ;;  %v1187_v36 = vpop.f32.mrb[3].mxu1 }
 0x20d   : > { %951 = vst.msk [vmem:[%s434_s13 + $0x8] sm:$0xff] %vm523_vm5, %v1192_v35 }
 0x20e PF: > { %s17_s28 = sadd.s32 1, %s1297_s28   ;;  %s1478_s24 = smov %s1289_s26 }
 0x20f   : > { %p14_p10 = scmp.ge.s32.totalorder %s17_s28, 8   ;;  %s1479_s25 = smov %s1293_s27 }
 0x210   : > { %s1480_s26 = smov %s1483_s29  ;;  %s1481_s27 = smov %s1487_s30 }
 0x211   :  { %16 = sbr.rel (!%p14_p10) target bundleno = 3 (0x3), region = 84 }

// kernel: resblock_forward.3
= control target key start
LH: loop header
LB: loop body
LE: loop exit
PB: predicated region body
PF: predicated region fallthrough
CT: control target
= control target key end

     0   :  { %s1343_s24 = smov 0   ;;  %s1345_s25 = smov 0   ;;  %s1468_s0 = inlined_call_operand.vmem [shape: f32[2,48,16], index: 0, kind: input, shape index: {}, may-alias: {0,1,2}]   ;;  %s1469_s1 = inlined_call_operand.vmem [shape: f32[2,48,16], index: 1, kind: input, shape index: {}, may-alias: {0,1,2}]   ;;  %s1470_s2 = inlined_call_operand.vmem [shape: f32[2,48,16], index: 2, kind: input, shape index: {}, may-alias: {0,1,2}]   ;;  %s1471_s3 = inlined_call_operand.vmem [shape: bf16[48,16], index: 3, kind: input, shape index: {}]   ;;  %s1472_s4 = inlined_call_operand.vmem [shape: f32[1,16], index: 4, kind: input, shape index: {}]   ;;  %s1473_s5 = inlined_call_operand.vmem [shape: bf16[48,16], index: 5, kind: input, shape index: {}]   ;;  %s1474_s6 = inlined_call_operand.vmem [shape: f32[1,16], index: 6, kind: input, shape index: {}]   ;;  %s1475_s7 = inlined_call_operand.vmem [shape: f32[2,48,16], index: 7, kind: output, shape index: {}]  }
   0x1   :  { %s1347_s26 = smov 0   ;;  %s1349_s27 = smov 0  }
   0x2   :  { %s1351_s28 = smov 0  }
   0x3 LB: > { %s26_s29 = sadd.s32 1, %s1290_s26  ;;  %s29_s30 = sadd.s32 1, %s1294_s27  ;;  %s1298_s28 = sphi %s1351_s28, %s17_s28   ;;  %s1294_s27 = sphi %s1349_s27, %s1480_s27   ;;  %s1290_s26 = sphi %s1347_s26, %s1479_s26   ;;  %s1286_s25 = sphi %s1345_s25, %s1478_s25   ;;  %s1282_s24 = sphi %s1343_s24, %s1477_s24  }
   0x4   : > { %p27_p0 = scmp.ge.s32.totalorder %s26_s29, 2  ;;  %p1089_p1 = scmp.ge.s32.totalorder %s1298_s28, 1 }
   0x5   : > { %p320_p2 = scmp.lt.s32.totalorder %s1298_s28, 7 }
   0x6   : > { %s1482_s29 = smov (%p27_p0, %s26_s29), 0  ;;  %s1484_s30 = smov (!%p27_p0, %s29_s30), %s1294_s27 }
   0x7   : > { %p321_p3 = pnand %p1089_p1, %p320_p2  ;;  %p31_p4 = scmp.ge.s32.totalorder %s1484_s30, 3 }
   0x8   : > { %v1254_v0 = vld [vmem:[%s1471_s3] sm:$0xff] (!%p321_p3)   ;;  %s1090_s10 = sshll.u32 (!%p321_p3), %s1286_s25, 1  ;;  %p388_p5 = scmp.lt.s32.totalorder (!%p321_p3), %s1282_s24, 1  ;;  %v1382_v1 = vld [vmem:[%s1471_s3 + $0x8] sm:$0xff] (!%p321_p3)   ;;  %v444_v2 = vlaneseq (!%p321_p3)  ;;  %v1300_v16 = vmov (!%p321_p3), 0   ;;  %v1256_v41 = vld [vmem:[%s1471_s3 + $0x10] sm:$0xff] (!%p321_p3)  }
   0x9   : > { %s1486_s30 = smov (%p31_p4, %s1484_s30), 0  ;;  %324 = sbr.rel (%p321_p3) target bundleno = 526 (0x20e), region = 48 }
   0xa   : > { %s1091_s11 = sadd.s32 (!%p321_p3), 4294967295, %s1090_s10  ;;  %1153 = vmatprep.subr.bf16.mxu0 (!%p321_p3), %v1254_v0  ;;  %p403_p8 = scmp.lt.s32.totalorder (!%p321_p3), %s1090_s10, 5  ;;  %v445_v3 = vshrl.u32 (!%p321_p3), %v444_v2, 7  ;;  %v1257_v49 = vld [vmem:[%s1473_s5] sm:$0xff] (!%p321_p3)   ;;  %v1301_v50 = vmov (!%p321_p3), 0.0  }
   0xb   : > { %p386_p6 = scmp.gt.s32.totalorder (!%p321_p3), %s1091_s11, 0  ;;  %p1092_p7 = scmp.lt.s32.totalorder (!%p321_p3), %s1091_s11, 5  ;;  %1154 = vmatpush3.bf16.msra.mxu0 (!%p321_p3), %v1254_v0  ;;  %1171 = vmatprep.subr.bf16.mxu1 (!%p321_p3), %v1301_v50  ;;  %v1111_v59 = vld [vmem:[%s1472_s4] ss:$0 sm:$0xff] (!%p321_p3) }
   0xc   : > { %1159 = vmatprep.subr.bf16.mxu0 (!%p321_p3), %v1382_v1  ;;  %s1137_s15 = sadd.s32 (!%p321_p3), 2, %s1090_s10  ;;  %v446_v4 = vadd.s32 (!%p321_p3), 8, %v445_v3  ;;  %v447_v5 = vadd.s32 (!%p321_p3), 16, %v445_v3  ;;  %v448_v6 = vadd.s32 (!%p321_p3), 24, %v445_v3  ;;  %s1107_s18 = sshll.u32 (!%p321_p3), %s1286_s25, 4  ;;  %1172 = vmatpush3.bf16.msra.mxu1 (!%p321_p3), %v1257_v49 }
   0xd   : > { %p1385_p9 = scmp.lt.s32.totalorder (!%p321_p3), %s1137_s15, 5  ;;  %s1108_s20 = sadd.s32 (!%p321_p3), 4294967288, %s1107_s18  ;;  %1177 = vmatprep.subr.bf16.mxu1 (!%p321_p3), %v1301_v50 }
   0xe   : > { %v451_v7 = vstv (!%p321_p3), %s1108_s20 }
   0xf   : > { %v452_v8 = vadd.s32 (!%p321_p3), %v451_v7, %v445_v3  ;;  %v453_v9 = vadd.s32 (!%p321_p3), %v451_v7, %v446_v4  ;;  %v454_v10 = vadd.s32 (!%p321_p3), %v451_v7, %v447_v5  ;;  %v455_v11 = vadd.s32 (!%p321_p3), %v451_v7, %v448_v6 }
  0x10   : > { %s1488_s24 = smov (!%p388_p5, %s1282_s24), 1  ;;  %s1490_s11 = smov (!%p386_p6, %s1091_s11), 0 }
  0x11   : > { %s1492_s11 = smov (!%p1092_p7, %s1490_s11), 5  ;;  %s1210_s14 = smul.u32 6, %s1488_s24  ;;  %vm456_vm0 = vcmp.ge.s32.totalorder %v452_v8, 0  ;;  %vm457_vm1 = vcmp.ge.s32.totalorder %v453_v9, 0  ;;  %vm458_vm2 = vcmp.ge.s32.totalorder %v454_v10, 0  ;;  %vm460_vm3 = vcmp.lt.s32.totalorder %v452_v8, 48 }
  0x12   : > { %s1494_s10 = smov (!%p403_p8, %s1090_s10), 5  ;;  %s1496_s15 = smov (!%p1385_p9, %s1137_s15), 5  ;;  %vm461_vm4 = vcmp.lt.s32.totalorder %v453_v9, 48  ;;  %vm462_vm5 = vcmp.lt.s32.totalorder %v454_v10, 48  ;;  %vm459_vm6 = vcmp.ge.s32.totalorder %v455_v11, 0  ;;  %vm463_vm7 = vcmp.lt.s32.totalorder %v455_v11, 48  ;;  %vm464_vm8 = vmand %vm456_vm0, %vm460_vm3 }
  0x13   : > { %s393_s17 = sadd.s32 %s1210_s14, %s1492_s11  ;;  %s406_s19 = sadd.s32 %s1210_s14, %s1494_s10  ;;  %vm465_vm9 = vmand %vm457_vm1, %vm461_vm4  ;;  %vm513_vm4 = vcmask 1044480  }
  0x14   : > { %s1498_s15 = smov (!%p1385_p9, %s1496_s15), 5  ;;  %s1097_s21 = sshll.u32 %s393_s17, 3  ;;  %vm466_vm10 = vmand %vm458_vm2, %vm462_vm5  ;;  %vm523_vm5 = vcmask 130048  }
  0x15   : > { %s1394_s22 = sshll.u32 %s406_s19, 3  ;;  %s419_s23 = sadd.s32 %s1210_s14, %s1498_s15  ;;  %vm467_vm11 = vmand %vm459_vm6, %vm463_vm7  ;;  %vm583_vm6 = vsmask.f32 4352  ;;  %vm666_vm7 = vcmask 1043456  }
  0x16   : > { %s1104_s24 = sshll.u32 %s419_s23, 3  ;;  %s395_s9 = scalar_lea.vmem %s1468_s0, %s1097_s21  ;;  %vm478_vm12 = vmpackc.low %vm464_vm8, %vm464_vm8  ;;  %vm1302_vm8 = vmmov 0  }
  0x17   : > { %s408_s12 = scalar_lea.vmem %s1469_s1, %s1394_s22  ;;  %s421_s15 = scalar_lea.vmem %s1470_s2, %s1104_s24  ;;  %v440_v12 = vld [vmem:[%s395_s9] sm:$0xff]  ;;  %vm479_vm13 = vmpackc.low %vm465_vm9, %vm465_vm9  ;;  %v482_v17 = vsel %vm478_vm12, 65537, %v1300_v16  ;;  %1173 = vmatprep.mubr.msk.bf16.mxu1 %vm1302_vm8, %v1301_v50 }
  0x18   : > { %v1406_v13 = vld [vmem:[%s408_s12] sm:$0xff]  ;;  %v1408_v14 = vld [vmem:[%s408_s12 + $0x8] sm:$0xff]  ;;  %vm480_vm14 = vmpackc.low %vm466_vm10, %vm466_vm10  ;;  %v483_v19 = vsel %vm479_vm13, 65537, %v1300_v16  ;;  %vm895_vm13 = vcmask 1046528   ;;  %s434_s13 = scalar_lea.vmem %s1475_s7, %s1394_s22 }
  0x19   : > { %v443_v15 = vld [vmem:[%s421_s15] sm:$0xff]  ;;  %v468_v18 = vpack.c.bf16 %v1406_v13, %v440_v12  ;;  %vm481_vm15 = vmpackc.low %vm467_vm11, %vm467_vm11  ;;  %v484_v20 = vsel %vm480_vm14, 65537, %v1300_v16  ;;  %v1109_v21 = vcombine.low %v482_v17, %v483_v19  ;;  %vm827_vm14 = vsmask.f32 7424 }
  0x1a   : > { %v469_v22 = vpack.c.bf16 %v443_v15, %v1408_v14  ;;  %v485_v23 = vsel %vm481_vm15, 65537, %v1300_v16  ;;  %v1258_v15 = vld [vmem:[%s1473_s5 + $0x8] sm:$0xff]  }
  0x1b   : > { %v1110_v24 = vcombine.low %v484_v20, %v485_v23  ;;  %vm492_vm0 = vcmp.ne.s16.totalorder %v1109_v21, 0  ;;  %v736_v53 = vshrl.u32 %v1109_v21, 16  ;;  %v739_v54 = vshll.u32 %v1109_v21, 16 }
  0x1c   : > { %v494_v25 = vsel %vm492_vm0, %v468_v18, 0 }
  0x1d   : > { %vm493_vm1 = vcmp.ne.s16.totalorder %v1110_v24, 0  ;;  %vm496_vm2 = vcmp.ge.bf16.partialorder %v494_v25, 0  ;;  %v498_v26 = vmul.bf16 1036860877, %v494_v25  ;;  %v744_v51 = vshrl.u32 %v1110_v24, 16 }
  0x1e   : > { %v495_v27 = vsel %vm493_vm1, %v469_v22, 0  ;;  %v747_v52 = vshll.u32 %v1110_v24, 16  ;;  %v738_v57 = vrot.slane %v736_v53, 3  ;;  %v741_v58 = vrot.slane %v739_v54, 4 }
  0x1f   : > { %vm497_vm3 = vcmp.ge.bf16.partialorder %v495_v27, 0  ;;  %v499_v28 = vmul.bf16 1036860877, %v495_v27  ;;  %v500_v29 = vsel %vm496_vm2, %v494_v25, %v498_v26  ;;  %v746_v55 = vrot.slane %v744_v51, 3 }
  0x20   : > { %v514_v30 = vrot.slane %v500_v29, 3  ;;  %v585_v31 = vshrl.u32 %v500_v29, 16  ;;  %v588_v32 = vshll.u32 %v500_v29, 16  ;;  %v667_v46 = vrot.slane %v500_v29, 4 }
  0x21   : > { %v501_v33 = vsel %vm497_vm3, %v495_v27, %v499_v28  ;;  %v749_v56 = vrot.slane %v747_v52, 4  ;;  %v742_v61 = vor.u32 %v741_v58, %v738_v57  ;;  %v1259_v27 = vld [vmem:[%s1473_s5 + $0x10] sm:$0xff]   ;;  %v1121_v28 = vld [vmem:[%s1474_s6] ss:$0 sm:$0xff] }
  0x22   : > { %v515_v34 = vrot.slane %v501_v33, 3  ;;  %v587_v35 = vrot.slane %v585_v31, 3  ;;  %v590_v36 = vrot.slane %v588_v32, 4  ;;  %v593_v37 = vshrl.u32 %v501_v33, 16 }
  0x23   : > { %v596_v38 = vshll.u32 %v501_v33, 16  ;;  %v668_v47 = vrot.slane %v501_v33, 4  ;;  %v750_v60 = vor.u32 %v749_v56, %v746_v55  ;;  %v769_v29 = vadd.f32 %v1121_v28, %v1406_v13 }
  0x24   : > { %v516_v39 = vsel %vm513_vm4, %v514_v30, %v515_v34  ;;  %v595_v40 = vrot.slane %v593_v37, 3  ;;  %v591_v42 = vor.u32 %v590_v36, %v587_v35  ;;  %v770_v30 = vadd.f32 %v1121_v28, %v1408_v14 }
  0x25   : > { %1155 = vmatprep.mubr.msk.bf16.mxu0 %vm523_vm5, %v516_v39  ;;  %v598_v43 = vrot.slane %v596_v38, 4  ;;  %v669_v48 = vsel %vm666_vm7, %v667_v46, %v668_v47  ;;  %vm753_vm9 = vcmp.ne.s16.totalorder %v750_v60, 0  ;;  %v751_v2 = vsel %vm583_vm6, %v742_v61, %v750_v60 }
  0x26   : > { %1156 = vmatmul.mubr.msk.bf16.vlgmr.msra.gmra.mrb[0].mxu0 %vm523_vm5, %v515_v34  ;;  %vm752_vm10 = vcmp.ne.s16.totalorder %v751_v2, 0 }
  0x27   : > { %1160 = vmatpush3.bf16.msra.mxu0 %v1382_v1  ;;  %v599_v44 = vor.u32 %v598_v43, %v595_v40 }
  0x28   : > { %1165 = vmatprep.subr.bf16.mxu0 %v1256_v41 }
  0x29   : > { %v600_v45 = vsel %vm583_vm6, %v591_v42, %v599_v44 }
  0x2a   : > { %1161 = vmatprep.mubr.msk.bf16.mxu0 %vm523_vm5, %v600_v45 }
  0x32   : > { %1162 = vmatmul.mubr.msk.bf16.vlgmr.msra.gmra.mrb[0].mxu0 %vm523_vm5, %v599_v44 }
  0x33   : > { %1166 = vmatpush3.bf16.msra.mxu0 %v1256_v41  ;;  %1167 = vmatprep.mubr.msk.bf16.mxu0 %vm523_vm5, %v669_v48 }
  0x3e   : > { %1168 = vmatmul.mubr.msk.bf16.vlgmr.msra.gmra.mrb[0].mxu0 %vm523_vm5, %v668_v47 }
 0x111   : > { %v1169_v62 = vpop.f32.mrb[0].mxu0 }
 0x112   : > { %v1189_v63 = vadd.f32 %v1169_v62, %v1111_v59  ;;  %v716_v0 = vpop.f32.mrb[1].mxu0 }
 0x113   : > { %v1170_v1 = vpop.f32.mrb[2].mxu0  ;;  %v1190_v5 = vadd.f32 %v1111_v59, %v716_v0 }
 0x114   : > { %v734_v3 = vpack.c.bf16 %v1189_v63, %v1189_v63  ;;  %v719_v4 = vpop.f32.mrb[3].mxu0 }
 0x115   : > { %v1191_v6 = vadd.f32 %v1111_v59, %v719_v4 }
 0x116   : > { %v755_v7 = vsel %vm753_vm9, %v734_v3, 0 }
 0x117   : > { %vm757_vm11 = vcmp.ge.bf16.partialorder %v755_v7, 0  ;;  %v759_v8 = vmul.bf16 1036860877, %v755_v7  ;;  %v733_v9 = vpack.c.bf16 %v1191_v6, %v1190_v5 }
 0x119   : > { %v754_v10 = vsel %vm752_vm10, %v733_v9, 0  ;;  %v761_v11 = vsel %vm757_vm11, %v755_v7, %v759_v8 }
 0x11a   : > { %v758_v12 = vmul.bf16 1036860877, %v754_v10  ;;  %vm756_vm12 = vcmp.ge.bf16.partialorder %v754_v10, 0  ;;  %v835_v17 = vshll.u32 %v761_v11, 16  ;;  %v897_v18 = vrot.slane %v761_v11, 1 }
 0x11c   : > { %v760_v16 = vsel %vm756_vm12, %v754_v10, %v758_v12  ;;  %v837_v24 = vrot.slane %v835_v17, 1 }
 0x11d   : > { %1174 = vmatmul.mubr.msk.bf16.vlgmr.msra.gmra.mrb[0].mxu1 %vm523_vm5, %v760_v16  ;;  %v830_v19 = vshll.u32 %v760_v16, 16  ;;  %v896_v20 = vrot.slane %v760_v16, 1  ;;  %v828_v21 = vshrl.u32 %v760_v16, 16 }
 0x11e   : > { %1178 = vmatpush3.bf16.msra.mxu1 %v1258_v15  ;;  %1179 = vmatprep.mubr.msk.bf16.mxu1 %vm1302_vm8, %v1301_v50 }
 0x11f   : > { %v832_v22 = vrot.slane %v830_v19, 1  ;;  %1183 = vmatprep.subr.bf16.mxu1 %v1301_v50  ;;  %v898_v23 = vsel %vm895_vm13, %v896_v20, %v897_v18 }
 0x121   : > { %v833_v25 = vor.u32 %v832_v22, %v828_v21 }
 0x123   : > { %v838_v26 = vsel %vm827_vm14, %v833_v25, %v837_v24 }
 0x129   : > { %1180 = vmatmul.mubr.msk.bf16.vlgmr.msra.gmra.mrb[0].mxu1 %vm523_vm5, %v838_v26 }
 0x12a   : > { %1184 = vmatpush3.bf16.msra.mxu1 %v1259_v27  ;;  %1185 = vmatprep.mubr.msk.bf16.mxu1 %vm1302_vm8, %v1301_v50 }
 0x135   : > { %1186 = vmatmul.mubr.msk.bf16.vlgmr.msra.gmra.mrb[0].mxu1 %vm523_vm5, %v898_v23 }
 0x208   : > { %v942_v31 = vpop.f32.mrb[0].mxu1 }
 0x209   : > { %v1192_v32 = vadd.f32 %v942_v31, %v769_v29  ;;  %v1187_v33 = vpop.f32.mrb[1].mxu1 }
 0x20a   : > { %v945_v34 = vpop.f32.mrb[2].mxu1 }
 0x20b   : > { %951 = vst.msk [vmem:[%s434_s13] sm:$0xff] %vm523_vm5, %v1192_v32  ;;  %v1193_v35 = vadd.f32 %v945_v34, %v770_v30  ;;  %v1188_v36 = vpop.f32.mrb[3].mxu1 }
 0x20d   : > { %952 = vst.msk [vmem:[%s434_s13 + $0x8] sm:$0xff] %vm523_vm5, %v1193_v35 }
 0x20e PF: > { %s17_s28 = sadd.s32 1, %s1298_s28   ;;  %s1477_s24 = smov %s1290_s26 }
 0x20f   : > { %p14_p10 = scmp.ge.s32.totalorder %s17_s28, 8   ;;  %s1478_s25 = smov %s1294_s27 }
 0x210   : > { %s1479_s26 = smov %s1482_s29  ;;  %s1480_s27 = smov %s1486_s30 }
 0x211   :  { %16 = sbr.rel (!%p14_p10) target bundleno = 3 (0x3), region = 84 }

</bundles_post_ra>
